<compile_context>
chip_gen: v6e
topology: v6e:2x2x1
jax: 0.10.0
libtpu: 0.0.40
codegen_flags: <defaults>
</compile_context>

<pallas_src>
import jax
import jax.numpy as jnp
from jax import lax
from jax.experimental import pallas as pl
from jax.experimental.pallas import tpu as pltpu


# ----------------------------------------------------------------------------
# Kernel: one batch element per grid step, everything 2-D.
# ----------------------------------------------------------------------------
def _self_attn_kernel(x_ref, wq_ref, bq_ref, wk_ref, bk_ref, wv_ref, bv_ref,
                      gamma_ref, out_ref, attn_ref):
    # x_ref: (N, C) f32.  Weights: bf16 (C, C8)/(C, C).  Biases: f32 (1, *).
    # gamma_ref: SMEM (1,) f32.
    x = x_ref[...]                                   # f32, kept for residual
    xb = x.astype(jnp.bfloat16)

    def proj(w_ref, b_ref):
        y = jnp.dot(xb, w_ref[...], preferred_element_type=jnp.float32)
        return y + b_ref[...]                        # f32 bias add (broadcast)

    q = proj(wq_ref, bq_ref)                         # (N, C8) f32
    k = proj(wk_ref, bk_ref)                         # (N, C8) f32
    v = proj(wv_ref, bv_ref)                         # (N, C)  f32

    # energy[i, j] = <q_i, k_j>   (== torch.bmm(proj_query, proj_key))
    # Contract last dims of both operands: MXU handles the implicit k^T.
    energy = lax.dot_general(
        q.astype(jnp.bfloat16), k.astype(jnp.bfloat16),
        dimension_numbers=(((1,), (1,)), ((), ())),
        preferred_element_type=jnp.float32)          # (N, N) f32

    # softmax(dim=-1), max-stabilized, f32; reciprocal goes to the EUP slot.
    m = jnp.max(energy, axis=-1, keepdims=True)
    e = jnp.exp(energy - m)
    inv = pl.reciprocal(jnp.sum(e, axis=-1, keepdims=True), approx=True)
    attn = e * inv

    # out[i, c] = sum_j attn[i, j] * v[j, c]
    #           (== torch.bmm(proj_value, attention.permute(0, 2, 1)))
    o = jnp.dot(attn.astype(jnp.bfloat16), v.astype(jnp.bfloat16),
                preferred_element_type=jnp.float32)  # (N, C) f32

    gamma = gamma_ref[0]                             # SMEM scalar read
    out_ref[...] = (gamma * o + x).astype(out_ref.dtype)
    attn_ref[...] = attn.astype(attn_ref.dtype)


# ----------------------------------------------------------------------------
# Wrapper (PyTorch Self_Attn.forward semantics)
# ----------------------------------------------------------------------------
def self_attn_forward(x, wq, bq, wk, bk, wv, bv, gamma):
    """Self_Attn forward.

    x:  (B, C, W, H)                 NCHW feature map (torch layout).
    wq/wk: (C//8, C, 1, 1), wv: (C, C, 1, 1)   torch Conv2d 1x1 weights.
    bq/bk: (C//8,), bv: (C,)          biases; gamma: scalar parameter.
    Returns (out: (B, C, W, H), attention: (B, N, N)) with N = W*H.
    """
    B, C, W, H = x.shape
    N = W * H
    C8 = wq.shape[0]

    # NCHW -> (B, N, C): rows = spatial positions, channel axis lane-dense.
    x_nc = jnp.transpose(x.reshape(B, C, N), (0, 2, 1)).astype(jnp.float32)

    # torch 1x1-conv weight (Cout, Cin, 1, 1) -> (Cin, Cout) matmul operand,
    # cast to bf16 for the MXU (accumulation stays f32 inside the kernel).
    wq_m = wq.reshape(C8, C).T.astype(jnp.bfloat16)
    wk_m = wk.reshape(C8, C).T.astype(jnp.bfloat16)
    wv_m = wv.reshape(C, C).T.astype(jnp.bfloat16)
    bq_m = bq.reshape(1, C8).astype(jnp.float32)
    bk_m = bk.reshape(1, C8).astype(jnp.float32)
    bv_m = bv.reshape(1, C).astype(jnp.float32)
    gamma_m = jnp.asarray(gamma, jnp.float32).reshape(1)

    out_nc, attn = pl.pallas_call(
        _self_attn_kernel,
        out_shape=(jax.ShapeDtypeStruct((B, N, C), jnp.float32),
                   jax.ShapeDtypeStruct((B, N, N), jnp.float32)),
        grid=(B,),
        in_specs=[
            pl.BlockSpec((None, N, C), lambda b: (b, 0, 0)),        # x (batch squeezed)
            pl.BlockSpec((C, C8), lambda b: (0, 0)),                # Wq (stays resident)
            pl.BlockSpec((1, C8), lambda b: (0, 0)),                # bq
            pl.BlockSpec((C, C8), lambda b: (0, 0)),                # Wk
            pl.BlockSpec((1, C8), lambda b: (0, 0)),                # bk
            pl.BlockSpec((C, C), lambda b: (0, 0)),                 # Wv
            pl.BlockSpec((1, C), lambda b: (0, 0)),                 # bv
            pl.BlockSpec(memory_space=pltpu.MemorySpace.SMEM),      # gamma
        ],
        out_specs=(pl.BlockSpec((None, N, C), lambda b: (b, 0, 0)),
                   pl.BlockSpec((None, N, N), lambda b: (b, 0, 0))),
        compiler_params=pltpu.CompilerParams(
            dimension_semantics=("parallel",),    # shard batch over TCs (v7x)
        ),
    )(x_nc, wq_m, bq_m, wk_m, bk_m, wv_m, bv_m, gamma_m)

    out = jnp.transpose(out_nc, (0, 2, 1)).reshape(B, C, W, H)
    return out, attn


# ----------------------------------------------------------------------------
# Plain-JAX reference (mirrors the PyTorch module, f32 everywhere)
# ----------------------------------------------------------------------------
def self_attn_reference(x, wq, bq, wk, bk, wv, bv, gamma):
    B, C, W, H = x.shape
    N = W * H
    xf = x.reshape(B, C, N)

    def conv1x1(w, b):
        return jnp.einsum("oc,bcn->bon", w.reshape(w.shape[0], C), xf) \
            + b[None, :, None]

    q = conv1x1(wq, bq)                               # (B, C8, N)
    k = conv1x1(wk, bk)                               # (B, C8, N)
    v = conv1x1(wv, bv)                               # (B, C,  N)
    energy = jnp.einsum("bdi,bdj->bij", q, k)         # bmm(q^T, k)
    attn = jax.nn.softmax(energy, axis=-1)
    o = jnp.einsum("bcj,bij->bci", v, attn)           # bmm(v, attn^T)
    out = gamma * o.reshape(B, C, W, H) + x
    return out, attn


if __name__ == "__main__":
    key = jax.random.PRNGKey(0)
    kx, kq, kbq, kk, kbk, kv, kbv = jax.random.split(key, 7)

    # Self_Attn(in_dim=128) on a 16x16 map: N = 256 and C = 128 keep both
    # outputs lane-dense (unmasked stores); C//8 = 16 query/key channels.
    B, C, W, H = 2, 128, 16, 16
    C8 = C // 8

    x = jax.random.normal(kx, (B, C, W, H), jnp.float32)
    wq = 0.05 * jax.random.normal(kq, (C8, C, 1, 1), jnp.float32)
    bq = 0.05 * jax.random.normal(kbq, (C8,), jnp.float32)
    wk = 0.05 * jax.random.normal(kk, (C8, C, 1, 1), jnp.float32)
    bk = 0.05 * jax.random.normal(kbk, (C8,), jnp.float32)
    wv = 0.05 * jax.random.normal(kv, (C, C, 1, 1), jnp.float32)
    bv = 0.05 * jax.random.normal(kbv, (C,), jnp.float32)
    # torch initializes gamma to 0; use a nonzero value so the residual path
    # (gamma * attn_out + x) is actually exercised by the check.
    gamma = jnp.float32(0.7)

    fwd = jax.jit(self_attn_forward)
    out, attn = fwd(x, wq, bq, wk, bk, wv, bv, gamma)
    out, attn = jax.block_until_ready((out, attn))

    assert out.shape == (B, C, W, H), out.shape
    assert attn.shape == (B, W * H, W * H), attn.shape
    assert bool(jnp.all(jnp.isfinite(out))) and bool(jnp.all(jnp.isfinite(attn)))

    out_ref, attn_ref = self_attn_reference(x, wq, bq, wk, bk, wv, bv, gamma)
    # Loose tolerances: kernel uses bf16 MXU operands with f32 accumulation.
    assert float(jnp.max(jnp.abs(attn - attn_ref))) < 1e-1
    assert float(jnp.mean(jnp.abs(attn - attn_ref))) < 2e-3
    assert float(jnp.max(jnp.abs(out - out_ref))) < 1e-1
    assert float(jnp.mean(jnp.abs(out - out_ref))) < 2e-2

    print("KERNEL_OK")
</pallas_src>

<mosaic_0001>
module attributes {stable_mosaic.version = 11 : i64} {
  func.func @_self_attn_kernel(%arg0: i32, %arg1: memref<1x256x128xf32, #tpu.memory_space<vmem>>, %arg2: memref<128x16xbf16, #tpu.memory_space<vmem>>, %arg3: memref<1x16xf32, #tpu.memory_space<vmem>>, %arg4: memref<128x16xbf16, #tpu.memory_space<vmem>>, %arg5: memref<1x16xf32, #tpu.memory_space<vmem>>, %arg6: memref<128x128xbf16, #tpu.memory_space<vmem>>, %arg7: memref<1x128xf32, #tpu.memory_space<vmem>>, %arg8: memref<1xf32, #tpu.memory_space<smem>>, %arg9: memref<1x256x128xf32, #tpu.memory_space<vmem>>, %arg10: memref<1x256x256xf32, #tpu.memory_space<vmem>>) attributes {dimension_semantics = [#tpu.dimension_semantics<parallel>], iteration_bounds = array<i64: 2>, scalar_prefetch = 0 : i64, scratch_operands = 0 : i64, tpu.core_type = #tpu.core_type<tc>, window_params = [{transform_indices = @transform_0, window_bounds = array<i64: 1, 256, 128>}, {pipeline_mode = #tpu.pipeline_mode<synchronous>, transform_indices = @transform_1, window_bounds = array<i64: 128, 16>}, {pipeline_mode = #tpu.pipeline_mode<synchronous>, transform_indices = @transform_2, window_bounds = array<i64: 1, 16>}, {pipeline_mode = #tpu.pipeline_mode<synchronous>, transform_indices = @transform_3, window_bounds = array<i64: 128, 16>}, {pipeline_mode = #tpu.pipeline_mode<synchronous>, transform_indices = @transform_4, window_bounds = array<i64: 1, 16>}, {pipeline_mode = #tpu.pipeline_mode<synchronous>, transform_indices = @transform_5, window_bounds = array<i64: 128, 128>}, {pipeline_mode = #tpu.pipeline_mode<synchronous>, transform_indices = @transform_6, window_bounds = array<i64: 1, 128>}, {transform_indices = @transform_7, window_bounds = array<i64: 1>}, {transform_indices = @transform_8, window_bounds = array<i64: 1, 256, 128>}, {transform_indices = @transform_9, window_bounds = array<i64: 1, 256, 256>}]} {
    %c0 = arith.constant 0 : index
    %c0_0 = arith.constant 0 : index
    %c0_1 = arith.constant 0 : index
    %0 = vector.load %arg1[%c0, %c0_0, %c0_1] : memref<1x256x128xf32, #tpu.memory_space<vmem>>, vector<1x256x128xf32>
    %1 = vector.shape_cast %0 : vector<1x256x128xf32> to vector<256x128xf32>
    %2 = arith.truncf %1 : vector<256x128xf32> to vector<256x128xbf16>
    %c0_2 = arith.constant 0 : index
    %c0_3 = arith.constant 0 : index
    %3 = vector.load %arg2[%c0_2, %c0_3] : memref<128x16xbf16, #tpu.memory_space<vmem>>, vector<128x16xbf16>
    %cst = arith.constant dense<0.000000e+00> : vector<256x16xf32>
    %4 = tpu.matmul %2, %3, %cst {dimension_numbers = #tpu.dot_dimension_numbers<[1], [0], [0], [1], [0, 0, 1, 1], [], []>} : vector<256x128xbf16>, vector<128x16xbf16>, vector<256x16xf32> -> vector<256x16xf32>
    %c0_4 = arith.constant 0 : index
    %c0_5 = arith.constant 0 : index
    %5 = vector.load %arg3[%c0_4, %c0_5] : memref<1x16xf32, #tpu.memory_space<vmem>>, vector<1x16xf32>
    %6 = vector.broadcast %5 : vector<1x16xf32> to vector<256x16xf32>
    %7 = arith.addf %4, %6 : vector<256x16xf32>
    %c0_6 = arith.constant 0 : index
    %c0_7 = arith.constant 0 : index
    %8 = vector.load %arg4[%c0_6, %c0_7] : memref<128x16xbf16, #tpu.memory_space<vmem>>, vector<128x16xbf16>
    %cst_8 = arith.constant dense<0.000000e+00> : vector<256x16xf32>
    %9 = tpu.matmul %2, %8, %cst_8 {dimension_numbers = #tpu.dot_dimension_numbers<[1], [0], [0], [1], [0, 0, 1, 1], [], []>} : vector<256x128xbf16>, vector<128x16xbf16>, vector<256x16xf32> -> vector<256x16xf32>
    %c0_9 = arith.constant 0 : index
    %c0_10 = arith.constant 0 : index
    %10 = vector.load %arg5[%c0_9, %c0_10] : memref<1x16xf32, #tpu.memory_space<vmem>>, vector<1x16xf32>
    %11 = vector.broadcast %10 : vector<1x16xf32> to vector<256x16xf32>
    %12 = arith.addf %9, %11 : vector<256x16xf32>
    %c0_11 = arith.constant 0 : index
    %c0_12 = arith.constant 0 : index
    %13 = vector.load %arg6[%c0_11, %c0_12] : memref<128x128xbf16, #tpu.memory_space<vmem>>, vector<128x128xbf16>
    %cst_13 = arith.constant dense<0.000000e+00> : vector<256x128xf32>
    %14 = tpu.matmul %2, %13, %cst_13 {dimension_numbers = #tpu.dot_dimension_numbers<[1], [0], [0], [1], [0, 0, 1, 1], [], []>} : vector<256x128xbf16>, vector<128x128xbf16>, vector<256x128xf32> -> vector<256x128xf32>
    %c0_14 = arith.constant 0 : index
    %c0_15 = arith.constant 0 : index
    %15 = vector.load %arg7[%c0_14, %c0_15] : memref<1x128xf32, #tpu.memory_space<vmem>>, vector<1x128xf32>
    %16 = vector.broadcast %15 : vector<1x128xf32> to vector<256x128xf32>
    %17 = arith.addf %14, %16 : vector<256x128xf32>
    %18 = arith.truncf %7 : vector<256x16xf32> to vector<256x16xbf16>
    %19 = arith.truncf %12 : vector<256x16xf32> to vector<256x16xbf16>
    %cst_16 = arith.constant dense<0.000000e+00> : vector<256x256xf32>
    %20 = tpu.matmul %18, %19, %cst_16 {dimension_numbers = #tpu.dot_dimension_numbers<[1], [1], [0], [0], [0, 0, 1, 0], [], []>} : vector<256x16xbf16>, vector<256x16xbf16>, vector<256x256xf32> -> vector<256x256xf32>
    %cst_17 = arith.constant dense<0xFF800000> : vector<256xf32>
    %21 = vector.multi_reduction <maximumf>, %20, %cst_17 [1] : vector<256x256xf32> to vector<256xf32>
    %22 = vector.shape_cast %21 : vector<256xf32> to vector<256x1xf32>
    %23 = vector.broadcast %22 : vector<256x1xf32> to vector<256x256xf32>
    %24 = arith.subf %20, %23 : vector<256x256xf32>
    %25 = math.exp %24 : vector<256x256xf32>
    %cst_18 = arith.constant dense<0.000000e+00> : vector<256xf32>
    %26 = vector.multi_reduction <add>, %25, %cst_18 [1] : vector<256x256xf32> to vector<256xf32>
    %27 = vector.shape_cast %26 : vector<256xf32> to vector<256x1xf32>
    %28 = tpu.reciprocal %27 {approx = true} : vector<256x1xf32> -> vector<256x1xf32>
    %29 = vector.broadcast %28 : vector<256x1xf32> to vector<256x256xf32>
    %30 = arith.mulf %25, %29 : vector<256x256xf32>
    %31 = arith.truncf %30 : vector<256x256xf32> to vector<256x256xbf16>
    %32 = arith.truncf %17 : vector<256x128xf32> to vector<256x128xbf16>
    %cst_19 = arith.constant dense<0.000000e+00> : vector<256x128xf32>
    %33 = tpu.matmul %31, %32, %cst_19 {dimension_numbers = #tpu.dot_dimension_numbers<[1], [0], [0], [1], [0, 0, 1, 1], [], []>} : vector<256x256xbf16>, vector<256x128xbf16>, vector<256x128xf32> -> vector<256x128xf32>
    %c0_20 = arith.constant 0 : index
    %34 = memref.load %arg8[%c0_20] : memref<1xf32, #tpu.memory_space<smem>>
    %35 = vector.broadcast %34 : f32 to vector<256x128xf32>
    %36 = arith.mulf %35, %33 : vector<256x128xf32>
    %37 = arith.addf %36, %1 : vector<256x128xf32>
    %c0_21 = arith.constant 0 : index
    %c0_22 = arith.constant 0 : index
    %c0_23 = arith.constant 0 : index
    %38 = vector.load %arg9[%c0_21, %c0_22, %c0_23] : memref<1x256x128xf32, #tpu.memory_space<vmem>>, vector<1x256x128xf32>
    %39 = vector.shape_cast %38 : vector<1x256x128xf32> to vector<256x128xf32>
    %40 = vector.shape_cast %37 : vector<256x128xf32> to vector<1x256x128xf32>
    tpu.vector_store %arg9[%c0_21, %c0_22, %c0_23], %40 {strides = array<i32>} : memref<1x256x128xf32, #tpu.memory_space<vmem>>, vector<1x256x128xf32>,
    %c0_24 = arith.constant 0 : index
    %c0_25 = arith.constant 0 : index
    %c0_26 = arith.constant 0 : index
    %41 = vector.load %arg10[%c0_24, %c0_25, %c0_26] : memref<1x256x256xf32, #tpu.memory_space<vmem>>, vector<1x256x256xf32>
    %42 = vector.shape_cast %41 : vector<1x256x256xf32> to vector<256x256xf32>
    %43 = vector.shape_cast %30 : vector<256x256xf32> to vector<1x256x256xf32>
    tpu.vector_store %arg10[%c0_24, %c0_25, %c0_26], %43 {strides = array<i32>} : memref<1x256x256xf32, #tpu.memory_space<vmem>>, vector<1x256x256xf32>,
    return
  }
  func.func @transform_0(%arg0: i32) -> (i32, i32, i32) {
    %c0_i32 = arith.constant 0 : i32
    %c0_i32_0 = arith.constant 0 : i32
    %c0_i32_1 = arith.constant 0 : i32
    return %arg0, %c0_i32, %c0_i32_0 : i32, i32, i32
  }
  func.func @transform_1(%arg0: i32) -> (i32, i32) {
    %c0_i32 = arith.constant 0 : i32
    %c0_i32_0 = arith.constant 0 : i32
    %c0_i32_1 = arith.constant 0 : i32
    return %c0_i32, %c0_i32_0 : i32, i32
  }
  func.func @transform_2(%arg0: i32) -> (i32, i32) {
    %c0_i32 = arith.constant 0 : i32
    %c0_i32_0 = arith.constant 0 : i32
    %c0_i32_1 = arith.constant 0 : i32
    return %c0_i32, %c0_i32_0 : i32, i32
  }
  func.func @transform_3(%arg0: i32) -> (i32, i32) {
    %c0_i32 = arith.constant 0 : i32
    %c0_i32_0 = arith.constant 0 : i32
    %c0_i32_1 = arith.constant 0 : i32
    return %c0_i32, %c0_i32_0 : i32, i32
  }
  func.func @transform_4(%arg0: i32) -> (i32, i32) {
    %c0_i32 = arith.constant 0 : i32
    %c0_i32_0 = arith.constant 0 : i32
    %c0_i32_1 = arith.constant 0 : i32
    return %c0_i32, %c0_i32_0 : i32, i32
  }
  func.func @transform_5(%arg0: i32) -> (i32, i32) {
    %c0_i32 = arith.constant 0 : i32
    %c0_i32_0 = arith.constant 0 : i32
    %c0_i32_1 = arith.constant 0 : i32
    return %c0_i32, %c0_i32_0 : i32, i32
  }
  func.func @transform_6(%arg0: i32) -> (i32, i32) {
    %c0_i32 = arith.constant 0 : i32
    %c0_i32_0 = arith.constant 0 : i32
    %c0_i32_1 = arith.constant 0 : i32
    return %c0_i32, %c0_i32_0 : i32, i32
  }
  func.func @transform_7(%arg0: i32) -> i32 {
    %c0_i32 = arith.constant 0 : i32
    %c0_i32_0 = arith.constant 0 : i32
    return %c0_i32 : i32
  }
  func.func @transform_8(%arg0: i32) -> (i32, i32, i32) {
    %c0_i32 = arith.constant 0 : i32
    %c0_i32_0 = arith.constant 0 : i32
    %c0_i32_1 = arith.constant 0 : i32
    return %arg0, %c0_i32, %c0_i32_0 : i32, i32, i32
  }
  func.func @transform_9(%arg0: i32) -> (i32, i32, i32) {
    %c0_i32 = arith.constant 0 : i32
    %c0_i32_0 = arith.constant 0 : i32
    %c0_i32_1 = arith.constant 0 : i32
    return %arg0, %c0_i32, %c0_i32_0 : i32, i32, i32
  }
}

</mosaic_0001>

<bundles_post_ra>
// kernel: self_attn_forward.1
= control target key start
LH: loop header
LB: loop body
LE: loop exit
PB: predicated region body
PF: predicated region fallthrough
CT: control target
= control target key end

     0   :  { %s4745_s0 = inlined_call_operand.hbm [shape: f32[2,256,128], index: 0, kind: input, shape index: {}]   ;;  %s4746_s1 = inlined_call_operand.vmem [shape: bf16[128,16], index: 1, kind: input, shape index: {}]   ;;  %s4747_s2 = inlined_call_operand.vmem [shape: f32[1,16], index: 2, kind: input, shape index: {}]   ;;  %s4748_s3 = inlined_call_operand.vmem [shape: bf16[128,16], index: 3, kind: input, shape index: {}]   ;;  %s4749_s4 = inlined_call_operand.vmem [shape: f32[1,16], index: 4, kind: input, shape index: {}]   ;;  %s4750_s5 = inlined_call_operand.vmem [shape: bf16[128,128], index: 5, kind: input, shape index: {}]   ;;  %s4751_s6 = inlined_call_operand.vmem [shape: f32[1,128], index: 6, kind: input, shape index: {}]   ;;  %s4752_s7 = inlined_call_operand.<no memory space> [shape: f32[1], index: 7, kind: input, shape index: {}]   ;;  %s4753_s8 = inlined_call_operand.hbm [shape: f32[2,256,128], index: 8, kind: output, shape index: {0}]   ;;  %s4754_s9 = inlined_call_operand.hbm [shape: f32[2,256,256], index: 9, kind: output, shape index: {1}]  }
   0x1   :  { %15 = sst [smem:[#allocation2]] %s4752_s7 }
   0x2   :  { %16 = vsyncpa [#allocation4], 0 }
   0x3   :  { %18 = vsyncpa [#allocation4 + $0x1], 0 }
   0x4   :  { %19 = vsyncpa [#allocation5], 0 }
   0x5   :  { %21 = vsyncpa [#allocation5 + $0x1], 0 }
   0x6   :  { %22 = vsyncpa [#allocation8], 0 }
   0x7   :  { %24 = vsyncpa [#allocation8 + $0x1], 0  ;;  %s3376_s11 = smov 0   ;;  %s3378_s12 = smov 0  }
   0x8   :  { %s3380_s13 = smov 0   ;;  %s3382_s14 = smov 0  }
   0x9 LB: > { %s3397_s7 = sadd.s32 4294967295, %s3312_s14   ;;  %s2421_s15 = sadd.s32 4294967294, %s3312_s14   ;;  %s3312_s14 = sphi %s3382_s14, %s4917_s14   ;;  %s3308_s13 = sphi %s3380_s13, %s4916_s13   ;;  %s3304_s12 = sphi %s3378_s12, %s4915_s12   ;;  %s3300_s11 = sphi %s3376_s11, %s4914_s11  }
   0xa   : > { %s3401_s16 = sadd.s32 1, %s3312_s14   ;;  %s37_s17 = sadd.s32 1, %s3308_s13 }
   0xb   : > { %s34_s18 = ssub.s32 %s3312_s14, %s3401_s16  ;;  %p44_p0 = scmp.ne.s32.totalorder %s3308_s13, %s3304_s12 }
   0xc   : > { %p35_p1 = scmp.eq.s32.totalorder %s34_s18, 0  ;;  %p45_p2 = scmp.eq.s32.totalorder %s3312_s14, 0 }
   0xd   : > { %p50_p3 = scmp.ne.s32.totalorder %s3304_s12, %s3300_s11  ;;  %p51_p4 = scmp.eq.s32.totalorder %s3397_s7, 0 }
   0xe   : > { %s3413_s19 = scalar_select %p35_p1, %s3308_s13, %s37_s17  }
   0xf   : > { %p3415_p5 = por %p45_p2, %p44_p0  ;;  %p3419_p6 = por %p51_p4, %p50_p3 }
  0x10   : > { %4802 = sst [smem:[#allocation12_spill]] %s3413_s19  ;;  %p221_p7 = scmp.eq.s32.totalorder %s3397_s7, 1 }
  0x11   : > { %s4804_s21 = scalar_select %p3419_p6, 1, 0 }
  0x12   : > { %p227_p8 = scmp.eq.s32.totalorder %s2421_s15, 1  ;;  %p2902_p10 = scmp.lt.s32.totalorder %s3312_s14, 2 }
  0x13   : > { %p3426_p11 = por %p221_p7, %p44_p0  ;;  %s294_s24 = sand.u32 1, %s3308_s13  }
  0x14   : > { %p3430_p12 = por %p227_p8, %p50_p3  ;;  %s2482_s25 = sshll.u32 %s3312_s14, 12 }
  0x15   : > { %s4805_s22 = scalar_select %p3426_p11, 1, 0 }
  0x16   : > { %s4806_s23 = scalar_select %p3430_p12, 1, 0 }
  0x17   : > { %s2424_s26 = sshll.u32 %s294_s24, 8  ;;  %s3439_s29 = scalar_lea.hbm %s4745_s0, %s2482_s25 }
  0x18   : > { %s298_s30 = scalar_lea.vmem [#allocation3], %s2424_s26  ;;  %p3443_p13 = pnand %p2902_p10, %p3415_p5 }
  0x19   : > { %s305_s10 = sshll.u32 %s298_s30, 4  ;;  %s3449_s17 = scalar_lea.sflag [#allocation4], %s294_s24  ;;  %s3447_s10 = int_to_ptr.vmem [resolvable:$true] %s305_s10 }
  0x1a   : > { %s3190_s18 = scalar_lea.hbm %s3439_s29, 4096  ;;  %p3192_p1 = pneg %p3443_p13 }
  0x1b   : > { %p3191_p0 = scmp.ne.s32.totalorder %s3439_s29, %s3190_s18  ;;  %s3195_s26 = scalar_lea.hbm %s4745_s0, 8192 }
  0x1c   : > { %p3196_p4 = scmp.lt.s32.totalorder %s3439_s29, %s4745_s0  ;;  %p3197_p5 = scmp.lt.s32.totalorder %s3195_s26, %s3190_s18 }
  0x1d   : > { %p3193_p2 = pnand %p3192_p1, %p3191_p0 }
  0x1e   : > { %p3198_p7 = por %p3197_p5, %p3196_p4 }
  0x1f   : > { %p3194_p3 = pneg %p3193_p2 }
  0x21   : > { %p3199_p8 = pnand %p3198_p7, %p3194_p3 }
  0x23   : > { %3202 = shalt.err (!%p3199_p8)
}
  0x24   : > { %s3203_s24 = scalar_lea.vmem %s3447_s10, 4096  ;;  %s3314_s30 = smov [#allocation3]  }
  0x25   : > { %p3204_p10 = scmp.ne.s32.totalorder %s3447_s10, %s3203_s24  ;;  %s3208_s19 = sshll.u32 %s3314_s30, 4  ;;  %s3209_s19 = int_to_ptr.vmem [resolvable:$false] %s3208_s19 }
  0x26   : > { %s3210_s25 = scalar_lea.vmem %s3209_s19, 8192  ;;  %p3211_p2 = scmp.lt.s32.totalorder %s3447_s10, %s3209_s19 }
  0x27   : > { %p3206_p9 = pnand %p3204_p10, %p3192_p1  ;;  %p3212_p12 = scmp.lt.s32.totalorder %s3210_s25, %s3203_s24 }
  0x29   : > { %p3207_p0 = pneg %p3206_p9  ;;  %p3213_p11 = por %p3212_p12, %p3211_p2 }
  0x2b   : > { %p3214_p6 = pnand %p3213_p11, %p3207_p0 }
  0x2d   : > { %3217 = shalt.err (!%p3214_p6)
}
  0x2e   : > { %s3315_s18 = smov 128   ;;  %s3316_s27 = smov 8  }
  0x2f   : > { %2894 = dma.hbm_to_vmem [thread:$0]  (!%p3443_p13), %s3439_s29, 4096, %s3447_s10, %s3449_s17, %s3315_s18, %s3315_s18, %s3316_s27  }
  0x30   : > { %p2427_p9 = scmp.ge.s32.totalorder %s3312_s14, 1  ;;  %p313_p1 = scmp.lt.s32.totalorder %s3312_s14, 3 }
  0x32   : > { %p314_p3 = pnand %p2427_p9, %p313_p1 }
  0x34   : > { %317 = sbr.rel (%p314_p3) target bundleno = 1371 (0x55b), region = 52 }
  0x39   : > { %s3473_s19 = sand.u32 1, %s3304_s12   ;;  %p4808_p6 = scmp.ne.s32.totalorder %s4804_s21, 0 }
  0x3a   : > { %s2428_s26 = sshll.u32 %s3473_s19, 8  ;;  %s320_s20 = scalar_lea.sflag [#allocation4], %s3473_s19 }
  0x3b   : > { %s3479_s28 = scalar_lea.vmem [#allocation3], %s2428_s26 }
  0x3c   : > { %3287 = dma.done.wait (%p4808_p6), %s320_s20, 4096  }
  0x3d   : > { %3289 = vsyncadd (%p4808_p6), %s320_s20, 4294963200  ;;  %v2942_v0 = vld [vmem:[%s4746_s1 + $0x38] sm:$0xff]   ;;  %v2943_v1 = vld [vmem:[%s4746_s1 + $0x30] sm:$0xff]   ;;  %vm1140_vm0 = vcmask 130048   ;;  %s2430_s20 = sshll.u32 %s3473_s19, 9  ;;  %s2119_s10 = sld [smem:[#allocation2]] }
  0x3e   : > { %2861 = vmatprep.subr.bf16.mxu1 %v2942_v0  ;;  %2717 = vmatprep.subr.bf16.mxu0 %v2942_v0  ;;  %v2944_v2 = vld [vmem:[%s4746_s1 + $0x28] sm:$0xff]   ;;  %v2945_v3 = vld [vmem:[%s4746_s1 + $0x20] sm:$0xff]   ;;  %v2946_v7 = vld [vmem:[%s4746_s1 + $0x18] sm:$0xff]   ;;  %s4377_s29 = scalar_lea.vmem [#allocation7], %s2430_s20  ;;  %s4567_s15 = scalar_lea.vmem [#allocation6], %s2428_s26 }
  0x3f   : > { %2869 = vmatpush3.bf16.msra.mxu1 %v2942_v0  ;;  %2718 = vmatpush3.bf16.msra.mxu0 %v2942_v0  ;;  %v380_v4 = vld [vmem:[%s3479_s28 + $0x80] sm:$0xff]  ;;  %v381_v5 = vld [vmem:[%s3479_s28 + $0x88] sm:$0xff]  ;;  %v2947_v8 = vld [vmem:[%s4746_s1 + $0x10] sm:$0xff]   ;;  %s2484_s26 = sshll.u32 %s3397_s7, 13  ;;  %s2316_s17 = sshll.u32 %s4377_s29, 4  ;;  %s4627_s17 = int_to_ptr.vmem [resolvable:$true] %s2316_s17 }
  0x40   : > { %2862 = vmatprep.subr.bf16.mxu1 %v2943_v1  ;;  %2719 = vmatprep.subr.bf16.mxu0 %v2943_v1  ;;  %v3499_v6 = vpack.c.bf16 %v381_v5, %v380_v4  ;;  %v2948_v9 = vld [vmem:[%s4746_s1 + $0x8] sm:$0xff]   ;;  %v364_v10 = vld [vmem:[%s3479_s28] sm:$0xff]  ;;  %v382_v14 = vld [vmem:[%s3479_s28 + $0x90] sm:$0xff]  ;;  %s4625_s21 = scalar_lea.hbm %s4754_s9, %s2484_s26  ;;  %s3218_s18 = scalar_lea.vmem %s4627_s17, 8192 }
  0x41   : > { %v365_v11 = vld [vmem:[%s3479_s28 + $0x8] sm:$0xff]  ;;  %v2949_v13 = vld [vmem:[%s4746_s1] sm:$0xff]   ;;  %v383_v15 = vld [vmem:[%s3479_s28 + $0x98] sm:$0xff]  ;;  %p3219_p11 = scmp.ne.s32.totalorder %s4627_s17, %s3218_s18  ;;  %p4909_p12 = scmp.ne.s32.totalorder %s4805_s22, 0 }
  0x42   : > { %2749 = vmatprep.mubr.bf16.mxu1 %v3499_v6  ;;  %v3513_v12 = vpack.c.bf16 %v365_v11, %v364_v10  ;;  %v2950_v16 = vld [vmem:[%s4748_s3 + $0x38] sm:$0xff]   ;;  %v384_v17 = vld [vmem:[%s3479_s28 + $0xa0] sm:$0xff]  ;;  %v385_v18 = vld [vmem:[%s3479_s28 + $0xa8] sm:$0xff]  ;;  %v3528_v21 = vpack.c.bf16 %v383_v15, %v382_v14  ;;  %s3317_s27 = smov [#allocation7]  }
  0x43   : > { %2870 = vmatpush3.bf16.msra.mxu1 %v2943_v1  ;;  %2720 = vmatpush3.bf16.msra.mxu0 %v2943_v1  ;;  %v366_v19 = vld [vmem:[%s3479_s28 + $0x10] sm:$0xff]  ;;  %v367_v20 = vld [vmem:[%s3479_s28 + $0x18] sm:$0xff]  ;;  %v3533_v23 = vpack.c.bf16 %v385_v18, %v384_v17  ;;  %v368_v24 = vld [vmem:[%s3479_s28 + $0x20] sm:$0xff]  ;;  %p3220_p13 = pnand %p3219_p11, %p4909_p12  ;;  %s3222_s20 = sshll.u32 %s3317_s27, 4  ;;  %s3223_s20 = int_to_ptr.vmem [resolvable:$false] %s3222_s20 }
  0x44   : > { %2863 = vmatprep.subr.bf16.mxu1 %v2944_v2  ;;  %2721 = vmatprep.subr.bf16.mxu0 %v2944_v2  ;;  %v2951_v22 = vld [vmem:[%s4748_s3 + $0x30] sm:$0xff]   ;;  %v369_v25 = vld [vmem:[%s3479_s28 + $0x28] sm:$0xff]  ;;  %v3538_v26 = vpack.c.bf16 %v367_v20, %v366_v19  ;;  %v387_v28 = vld [vmem:[%s3479_s28 + $0xb8] sm:$0xff]  ;;  %p3225_p5 = scmp.lt.s32.totalorder %s4627_s17, %s3223_s20 }
  0x45   : > { %2733 = vmatprep.mubr.bf16.mxu0 %v3513_v12  ;;  %v386_v27 = vld [vmem:[%s3479_s28 + $0xb0] sm:$0xff]  ;;  %v3543_v29 = vpack.c.bf16 %v369_v25, %v368_v24  ;;  %v2952_v30 = vld [vmem:[%s4748_s3 + $0x28] sm:$0xff]   ;;  %v388_v31 = vld [vmem:[%s3479_s28 + $0xc0] sm:$0xff]  ;;  %p3221_p4 = pneg %p3220_p13 }
  0x46   : > { %v389_v32 = vld [vmem:[%s3479_s28 + $0xc8] sm:$0xff]  ;;  %v3552_v33 = vpack.c.bf16 %v387_v28, %v386_v27  ;;  %v370_v35 = vld [vmem:[%s3479_s28 + $0x30] sm:$0xff]  ;;  %v371_v36 = vld [vmem:[%s3479_s28 + $0x38] sm:$0xff] }
  0x47   : > { %2871 = vmatpush3.bf16.msra.mxu1 %v2944_v2  ;;  %2722 = vmatpush3.bf16.msra.mxu0 %v2944_v2  ;;  %v3554_v34 = vpack.c.bf16 %v389_v32, %v388_v31  ;;  %v2953_v37 = vld [vmem:[%s4748_s3 + $0x20] sm:$0xff]   ;;  %v373_v39 = vld [vmem:[%s3479_s28 + $0x48] sm:$0xff]  ;;  %v3564_v40 = vpack.c.bf16 %v371_v36, %v370_v35  ;;  %v390_v41 = vld [vmem:[%s3479_s28 + $0xd0] sm:$0xff] }
  0x48   : > { %2864 = vmatprep.subr.bf16.mxu1 %v2945_v3  ;;  %2723 = vmatprep.subr.bf16.mxu0 %v2945_v3  ;;  %v372_v38 = vld [vmem:[%s3479_s28 + $0x40] sm:$0xff]  ;;  %v391_v42 = vld [vmem:[%s3479_s28 + $0xd8] sm:$0xff]  ;;  %v393_v46 = vld [vmem:[%s3479_s28 + $0xe8] sm:$0xff] }
  0x49   : > { %v3569_v43 = vpack.c.bf16 %v373_v39, %v372_v38  ;;  %v2954_v44 = vld [vmem:[%s4748_s3 + $0x18] sm:$0xff]   ;;  %v392_v45 = vld [vmem:[%s3479_s28 + $0xe0] sm:$0xff]  ;;  %v3578_v47 = vpack.c.bf16 %v391_v42, %v390_v41  ;;  %v374_v49 = vld [vmem:[%s3479_s28 + $0x50] sm:$0xff] }
  0x4a   : > { %v3580_v48 = vpack.c.bf16 %v393_v46, %v392_v45  ;;  %v375_v50 = vld [vmem:[%s3479_s28 + $0x58] sm:$0xff]  ;;  %v2955_v51 = vld [vmem:[%s4748_s3 + $0x10] sm:$0xff]   ;;  %v376_v52 = vld [vmem:[%s3479_s28 + $0x60] sm:$0xff] }
  0x4b   : > { %2872 = vmatpush3.bf16.msra.mxu1 %v2945_v3  ;;  %2724 = vmatpush3.bf16.msra.mxu0 %v2945_v3  ;;  %v377_v53 = vld [vmem:[%s3479_s28 + $0x68] sm:$0xff]  ;;  %v3590_v54 = vpack.c.bf16 %v375_v50, %v374_v49  ;;  %v394_v55 = vld [vmem:[%s3479_s28 + $0xf0] sm:$0xff]  ;;  %v395_v56 = vld [vmem:[%s3479_s28 + $0xf8] sm:$0xff] }
  0x4c   : > { %2865 = vmatprep.subr.bf16.mxu1 %v2946_v7  ;;  %2725 = vmatprep.subr.bf16.mxu0 %v2946_v7  ;;  %v3595_v57 = vpack.c.bf16 %v377_v53, %v376_v52  ;;  %v2956_v58 = vld [vmem:[%s4748_s3 + $0x8] sm:$0xff]   ;;  %v3602_v59 = vpack.c.bf16 %v395_v56, %v394_v55  ;;  %v378_v60 = vld [vmem:[%s3479_s28 + $0x70] sm:$0xff]  ;;  %v379_v61 = vld [vmem:[%s3479_s28 + $0x78] sm:$0xff] }
  0x4d   : > { %v2957_v62 = vld [vmem:[%s4748_s3] sm:$0xff]   ;;  %v3610_v63 = vpack.c.bf16 %v379_v61, %v378_v60 }
  0x4e   : > { %4809 = vst [vmem:[#allocation13_spill] sm:$0xff] %v3602_v59  ;;  %v3633_v1 = vld [vmem:[%s4747_s2] ss:$0 sm:$0xff] }
  0x4f   : > { %2873 = vmatpush3.bf16.msra.mxu1 %v2946_v7  ;;  %2726 = vmatpush3.bf16.msra.mxu0 %v2946_v7 }
  0x50   : > { %2866 = vmatprep.subr.bf16.mxu1 %v2947_v8  ;;  %2727 = vmatprep.subr.bf16.mxu0 %v2947_v8 }
  0x53   : > { %2874 = vmatpush3.bf16.msra.mxu1 %v2947_v8  ;;  %2728 = vmatpush3.bf16.msra.mxu0 %v2947_v8 }
  0x54   : > { %2867 = vmatprep.subr.bf16.mxu1 %v2948_v9  ;;  %2729 = vmatprep.subr.bf16.mxu0 %v2948_v9 }
  0x57   : > { %2875 = vmatpush3.bf16.msra.mxu1 %v2948_v9  ;;  %2730 = vmatpush3.bf16.msra.mxu0 %v2948_v9 }
  0x58   : > { %2868 = vmatprep.subr.bf16.mxu1 %v2949_v13  ;;  %2731 = vmatprep.subr.bf16.mxu0 %v2949_v13 }
  0x5b   : > { %2876 = vmatpush3.bf16.msra.mxu1 %v2949_v13  ;;  %2732 = vmatpush3.bf16.msra.mxu0 %v2949_v13 }
  0x5c   : > { %2765 = vmatprep.subr.bf16.mxu1 %v2950_v16 }
  0x5e   : > { %2750 = vmatmul.mubr.bf16.vlgmr.msra.gmra.mxu1 %v3528_v21  ;;  %2734 = vmatmul.mubr.bf16.vlgmr.msra.gmra.mxu0 %v3538_v26 }
  0x5f   : > { %2766 = vmatpush3.bf16.msra.mxu1 %v2950_v16  ;;  %2753 = vmatprep.mubr.bf16.mxu1 %v3533_v23 }
  0x60   : > { %2767 = vmatprep.subr.bf16.mxu1 %v2951_v22  ;;  %2737 = vmatprep.mubr.bf16.mxu0 %v3543_v29 }
  0x63   : > { %2768 = vmatpush3.bf16.msra.mxu1 %v2951_v22 }
  0x64   : > { %2769 = vmatprep.subr.bf16.mxu1 %v2952_v30 }
  0x66   : > { %2754 = vmatmul.mubr.bf16.gmra.mxu1 %v3552_v33  ;;  %2738 = vmatmul.mubr.bf16.gmra.mxu0 %v3564_v40 }
  0x67   : > { %2770 = vmatpush3.bf16.msra.mxu1 %v2952_v30  ;;  %2757 = vmatprep.mubr.bf16.mxu1 %v3554_v34 }
  0x68   : > { %2771 = vmatprep.subr.bf16.mxu1 %v2953_v37  ;;  %2741 = vmatprep.mubr.bf16.mxu0 %v3569_v43 }
  0x6b   : > { %2772 = vmatpush3.bf16.msra.mxu1 %v2953_v37 }
  0x6c   : > { %2773 = vmatprep.subr.bf16.mxu1 %v2954_v44 }
  0x6e   : > { %2758 = vmatmul.mubr.bf16.gmra.mxu1 %v3578_v47  ;;  %2742 = vmatmul.mubr.bf16.gmra.mxu0 %v3590_v54 }
  0x6f   : > { %2774 = vmatpush3.bf16.msra.mxu1 %v2954_v44  ;;  %2761 = vmatprep.mubr.bf16.mxu1 %v3580_v48 }
  0x70   : > { %2775 = vmatprep.subr.bf16.mxu1 %v2955_v51  ;;  %2745 = vmatprep.mubr.bf16.mxu0 %v3595_v57 }
  0x73   : > { %2776 = vmatpush3.bf16.msra.mxu1 %v2955_v51 }
  0x74   : > { %2777 = vmatprep.subr.bf16.mxu1 %v2956_v58 }
  0x76   : > { %2762 = vmatmul.mubr.bf16.gmra.mxu1 %v3602_v59  ;;  %2746 = vmatmul.mubr.bf16.gmra.mxu0 %v3610_v63 }
  0x77   : > { %2778 = vmatpush3.bf16.msra.mxu1 %v2956_v58  ;;  %2781 = vmatprep.mubr.bf16.mxu1 %v3513_v12 }
  0x78   : > { %2779 = vmatprep.subr.bf16.mxu1 %v2957_v62  ;;  %2829 = vmatprep.mubr.bf16.mxu0 %v3513_v12 }
  0x7b   : > { %2780 = vmatpush3.bf16.msra.mxu1 %v2957_v62 }
  0x7e   : > { %2782 = vmatmul.mubr.bf16.vlgmr.msra.gmra.mxu1 %v3538_v26 }
  0x7f   : > { %2785 = vmatprep.mubr.bf16.mxu1 %v3543_v29 }
  0x86   : > { %2786 = vmatmul.mubr.bf16.gmra.mxu1 %v3564_v40 }
  0x87   : > { %2789 = vmatprep.mubr.bf16.mxu1 %v3569_v43 }
  0x8e   : > { %2790 = vmatmul.mubr.bf16.gmra.mxu1 %v3590_v54 }
  0x8f   : > { %2793 = vmatprep.mubr.bf16.mxu1 %v3595_v57 }
  0x96   : > { %2794 = vmatmul.mubr.bf16.gmra.mxu1 %v3610_v63 }
  0x97   : > { %2797 = vmatprep.mubr.bf16.mxu1 %v3499_v6 }
  0x9e   : > { %2798 = vmatmul.mubr.bf16.gmra.mxu1 %v3528_v21 }
  0x9f   : > { %2801 = vmatprep.mubr.bf16.mxu1 %v3533_v23 }
  0xa6   : > { %2802 = vmatmul.mubr.bf16.gmra.mxu1 %v3552_v33 }
  0xa7   : > { %2805 = vmatprep.mubr.bf16.mxu1 %v3554_v34 }
  0xae   : > { %2806 = vmatmul.mubr.bf16.gmra.mxu1 %v3578_v47 }
  0xaf   : > { %2809 = vmatprep.mubr.bf16.mxu1 %v3580_v48 }
  0xb6   : > { %2810 = vmatmul.mubr.bf16.gmra.mxu1 %v3602_v59 }
 0x11e   : > { %v2751_v0 = vpop.f32.mrf.mxu1  ;;  %v2735_v14 = vpop.f32.mrf.mxu0 }
 0x11f   : > { %v590_v4 = vadd.f32 %v2751_v0, %v3633_v1  ;;  %v526_v30 = vadd.f32 %v2735_v14, %v3633_v1 }
 0x120   : > { %v581_v2 = vpop.f32.mrf.mxu1  ;;  %v517_v24 = vpop.f32.mrf.mxu0 }
 0x121   : > { %v582_v8 = vadd.f32 %v3633_v1, %v581_v2  ;;  %v518_v35 = vadd.f32 %v3633_v1, %v517_v24 }
 0x122   : > { %v2752_v3 = vpop.f32.mrf.mxu1  ;;  %v2736_v31 = vpop.f32.mrf.mxu0 }
 0x123   : > { %v593_v5 = vadd.f32 %v2752_v3, %v3633_v1  ;;  %v529_v36 = vadd.f32 %v2736_v31, %v3633_v1 }
 0x124   : > { %v584_v7 = vpop.f32.mrf.mxu1  ;;  %v520_v39 = vpop.f32.mrf.mxu0 }
 0x125   : > { %v3638_v9 = vpack.c.bf16 %v593_v5, %v590_v4  ;;  %v585_v10 = vadd.f32 %v3633_v1, %v584_v7  ;;  %v3656_v42 = vpack.c.bf16 %v529_v36, %v526_v30  ;;  %v521_v44 = vadd.f32 %v3633_v1, %v520_v39  ;;  %v3680_v4 = vld [vmem:[%s4749_s4] ss:$0 sm:$0xff] }
 0x126   : > { %v2755_v11 = vpop.f32.mrf.mxu1 }
 0x127   : > { %v3641_v12 = vpack.c.bf16 %v585_v10, %v582_v8  ;;  %v606_v16 = vadd.f32 %v2755_v11, %v3633_v1  ;;  %v3663_v51 = vpack.c.bf16 %v521_v44, %v518_v35 }
 0x128   : > { %v597_v13 = vpop.f32.mrf.mxu1 }
 0x129   : > { %v598_v19 = vadd.f32 %v3633_v1, %v597_v13  ;;  %2573 = vmatprep.mubr.msk.bf16.mxu1 %vm1140_vm0, %v3663_v51 }
 0x12a   : > { %v2756_v15 = vpop.f32.mrf.mxu1 }
 0x12b   : > { %v609_v17 = vadd.f32 %v2756_v15, %v3633_v1 }
 0x12c   : > { %v600_v18 = vpop.f32.mrf.mxu1 }
 0x12d   : > { %v3646_v20 = vpack.c.bf16 %v609_v17, %v606_v16  ;;  %v601_v22 = vadd.f32 %v3633_v1, %v600_v18 }
 0x12e   : > { %v2759_v25 = vpop.f32.mrf.mxu1 }
 0x12f   : > { %v3649_v27 = vpack.c.bf16 %v601_v22, %v598_v19  ;;  %v622_v37 = vadd.f32 %v2759_v25, %v3633_v1 }
 0x130   : > { %v613_v28 = vpop.f32.mrf.mxu1 }
 0x131   : > { %v614_v45 = vadd.f32 %v3633_v1, %v613_v28 }
 0x132   : > { %v2760_v32 = vpop.f32.mrf.mxu1 }
 0x133   : > { %v625_v38 = vadd.f32 %v2760_v32, %v3633_v1 }
 0x134   : > { %v616_v41 = vpop.f32.mrf.mxu1 }
 0x135   : > { %v3660_v46 = vpack.c.bf16 %v625_v38, %v622_v37  ;;  %v617_v49 = vadd.f32 %v3633_v1, %v616_v41 }
 0x136   : > { %v2763_v50 = vpop.f32.mrf.mxu1 }
 0x137   : > { %4810 = vst [vmem:[#allocation14_spill] sm:$0xff] %v3660_v46  ;;  %v3665_v52 = vpack.c.bf16 %v617_v49, %v614_v45  ;;  %v638_v56 = vadd.f32 %v2763_v50, %v3633_v1 }
 0x138   : > { %v629_v53 = vpop.f32.mrf.mxu1 }
 0x139   : > { %4811 = vst [vmem:[#allocation15_spill] sm:$0xff] %v3665_v52  ;;  %v630_v61 = vadd.f32 %v3633_v1, %v629_v53 }
 0x13a   : > { %v2764_v55 = vpop.f32.mrf.mxu1 }
 0x13b   : > { %v641_v58 = vadd.f32 %v2764_v55, %v3633_v1 }
 0x13c   : > { %v632_v60 = vpop.f32.mrf.mxu1 }
 0x13d   : > { %v3672_v62 = vpack.c.bf16 %v641_v58, %v638_v56  ;;  %v633_v0 = vadd.f32 %v3633_v1, %v632_v60 }
 0x13e   : > { %v2783_v2 = vpop.f32.mrf.mxu1 }
 0x13f   : > { %4812 = vst [vmem:[#allocation16_spill] sm:$0xff] %v3672_v62  ;;  %v3675_v3 = vpack.c.bf16 %v633_v0, %v630_v61  ;;  %v3683_v8 = vadd.f32 %v2783_v2, %v3680_v4 }
 0x140   : > { %v749_v5 = vpop.f32.mrf.mxu1 }
 0x141   : > { %4813 = vst [vmem:[#allocation17_spill] sm:$0xff] %v3675_v3  ;;  %v3689_v13 = vadd.f32 %v3680_v4, %v749_v5 }
 0x142   : > { %v2784_v7 = vpop.f32.mrf.mxu1 }
 0x143   : > { %v3686_v10 = vadd.f32 %v2784_v7, %v3680_v4 }
 0x144   : > { %v752_v11 = vpop.f32.mrf.mxu1 }
 0x145   : > { %v3694_v15 = vadd.f32 %v3680_v4, %v752_v11 }
 0x146   : > { %v2787_v16 = vpop.f32.mrf.mxu1 }
 0x147   : > { %v3699_v22 = vadd.f32 %v2787_v16, %v3680_v4 }
 0x148   : > { %v765_v18 = vpop.f32.mrf.mxu1 }
 0x149   : > { %v3705_v28 = vadd.f32 %v3680_v4, %v765_v18 }
 0x14a   : > { %v2788_v19 = vpop.f32.mrf.mxu1 }
 0x14b   : > { %v3702_v24 = vadd.f32 %v2788_v19, %v3680_v4 }
 0x14c   : > { %v768_v25 = vpop.f32.mrf.mxu1 }
 0x14d   : > { %v3710_v31 = vadd.f32 %v3680_v4, %v768_v25 }
 0x14e   : > { %v2791_v32 = vpop.f32.mrf.mxu1 }
 0x150   : > { %v781_v36 = vpop.f32.mrf.mxu1 }
 0x152   : > { %v2792_v37 = vpop.f32.mrf.mxu1 }
 0x154   : > { %v784_v38 = vpop.f32.mrf.mxu1 }
 0x156   : > { %v2795_v39 = vpop.f32.mrf.mxu1 }
 0x157   : > { %v806_v14 = vadd.f32 %v2795_v39, %v3680_v4 }
 0x158   : > { %v797_v41 = vpop.f32.mrf.mxu1 }
 0x15a   : > { %v2796_v44 = vpop.f32.mrf.mxu1 }
 0x15c   : > { %v800_v45 = vpop.f32.mrf.mxu1 }
 0x15d   : > { %v801_v52 = vadd.f32 %v3680_v4, %v800_v45 }
 0x15e   : > { %v2799_v49 = vpop.f32.mrf.mxu1 }
 0x15f   : > { %v3715_v55 = vadd.f32 %v2799_v49, %v3680_v4 }
 0x160   : > { %v813_v50 = vpop.f32.mrf.mxu1 }
 0x161   : > { %v3721_v60 = vadd.f32 %v3680_v4, %v813_v50  ;;  %v809_v50 = vadd.f32 %v2796_v44, %v3680_v4 }
 0x162   : > { %v2800_v53 = vpop.f32.mrf.mxu1 }
 0x163   : > { %v3718_v56 = vadd.f32 %v2800_v53, %v3680_v4 }
 0x164   : > { %v816_v58 = vpop.f32.mrf.mxu1 }
 0x165   : > { %v3726_v0 = vadd.f32 %v3680_v4, %v816_v58  ;;  %v1131_v58 = vpack.c.bf16 %v809_v50, %v806_v14  ;;  %v798_v14 = vadd.f32 %v3680_v4, %v797_v41 }
 0x166   : > { %v2803_v2 = vpop.f32.mrf.mxu1 }
 0x167   : > { %v1211_v44 = vsel %vm1140_vm0, %v1131_v58, 0  ;;  %v1130_v39 = vpack.c.bf16 %v801_v52, %v798_v14  ;;  %v785_v52 = vadd.f32 %v3680_v4, %v784_v38 }
 0x168   : > { %v829_v7 = vpop.f32.mrf.mxu1 }
 0x169   : > { %v1208_v45 = vsel %vm1140_vm0, %v1130_v39, 0  ;;  %v2962_v39 = vld [vmem:[%s4750_s5 + $0x18] sm:$0xff]  }
 0x16a   : > { %v2804_v11 = vpop.f32.mrf.mxu1 }
 0x16c   : > { %v832_v16 = vpop.f32.mrf.mxu1 }
 0x16d   : > { %v833_v38 = vadd.f32 %v3680_v4, %v832_v16  ;;  %v4816_v16 = vpack.c.bf16 %v3718_v56, %v3715_v55  ;;  %v2958_v56 = vld [vmem:[%s4750_s5 + $0x38] sm:$0xff]  }
 0x16e   : > { %v2807_v18 = vpop.f32.mrf.mxu1  ;;  %2813 = vmatprep.subr.bf16.mxu0 %v2958_v56 }
 0x16f   : > { %2814 = vmatpush3.bf16.msra.mxu0 %v2958_v56 }
 0x170   : > { %v845_v19 = vpop.f32.mrf.mxu1 }
 0x172   : > { %v2808_v25 = vpop.f32.mrf.mxu1 }
 0x174   : > { %v848_v49 = vpop.f32.mrf.mxu1 }
 0x176   : > { %v2811_v53 = vpop.f32.mrf.mxu1 }
 0x177   : > { %v870_v35 = vadd.f32 %v2811_v53, %v3680_v4 }
 0x178   : > { %v861_v17 = vpop.f32.mrf.mxu1 }
 0x179   : > { %v862_v62 = vadd.f32 %v3680_v4, %v861_v17  ;;  %v854_v17 = vadd.f32 %v2807_v18, %v3680_v4 }
 0x17a   : > { %v2812_v61 = vpop.f32.mrf.mxu1 }
 0x17b   : > { %v873_v30 = vadd.f32 %v2812_v61, %v3680_v4  ;;  %v857_v61 = vadd.f32 %v2808_v25, %v3680_v4  ;;  %v838_v25 = vadd.f32 %v2803_v2, %v3680_v4  ;;  %v4815_v2 = vpack.c.bf16 %v3710_v31, %v3705_v28  ;;  %v2739_v28 = vpop.f32.mrf.mxu0 }
 0x17c   : > { %v864_v5 = vpop.f32.mrf.mxu1 }
 0x17d   : > { %v1139_v3 = vpack.c.bf16 %v873_v30, %v870_v35  ;;  %v865_v46 = vadd.f32 %v3680_v4, %v864_v5  ;;  %v793_v30 = vadd.f32 %v2792_v37, %v3680_v4  ;;  %v1137_v35 = vpack.c.bf16 %v857_v61, %v854_v17  ;;  %v533_v31 = vpop.f32.mrf.mxu0  ;;  %v2963_v17 = vld [vmem:[%s4750_s5 + $0x10] sm:$0xff]  }
 0x17e   : > { %v782_v37 = vadd.f32 %v3680_v4, %v781_v36  ;;  %v4814_v36 = vpack.c.bf16 %v3702_v24, %v3699_v22  ;;  %v4818_v24 = vpack.c.bf16 %v3726_v0, %v3721_v60  ;;  %v2960_v60 = vld [vmem:[%s4750_s5 + $0x28] sm:$0xff]   ;;  %v534_v0 = vadd.f32 %v3633_v1, %v533_v31 }
 0x17f   : > { %v1138_v59 = vpack.c.bf16 %v865_v46, %v862_v62  ;;  %2877 = vmatprep.subr.msk.bf16.mxu1 %vm1140_vm0, %v1139_v3  ;;  %v790_v46 = vadd.f32 %v2791_v32, %v3680_v4  ;;  %v849_v3 = vadd.f32 %v3680_v4, %v848_v49  ;;  %v841_v32 = vadd.f32 %v2804_v11, %v3680_v4 }
 0x180   : > { %2558 = vmatpush3.bf16.xpose.msra.mxu1 %v1211_v44  ;;  %v1128_v18 = vpack.c.bf16 %v785_v52, %v782_v37  ;;  %v1199_v58 = vsel %vm1140_vm0, %v4814_v36, 0  ;;  %v1196_v11 = vsel %vm1140_vm0, %v4815_v2, 0 }
 0x181   : > { %2878 = vmatprep.subr.msk.bf16.mxu1 %vm1140_vm0, %v1138_v59  ;;  %v1129_v62 = vpack.c.bf16 %v793_v30, %v790_v46  ;;  %v846_v59 = vadd.f32 %v3680_v4, %v845_v19  ;;  %v1135_v53 = vpack.c.bf16 %v841_v32, %v838_v25  ;;  %v830_v19 = vadd.f32 %v3680_v4, %v829_v7  ;;  %v2964_v46 = vld [vmem:[%s4750_s5 + $0x8] sm:$0xff]  }
 0x182   : > { %v1202_v49 = vsel %vm1140_vm0, %v1128_v18, 0  ;;  %v4817_v4 = vpack.c.bf16 %v3686_v10, %v3683_v8  ;;  %v4819_v7 = vpack.c.bf16 %v3694_v15, %v3689_v13  ;;  %v2959_v8 = vld [vmem:[%s4750_s5 + $0x30] sm:$0xff]   ;;  %v2740_v10 = vpop.f32.mrf.mxu0  ;;  %v2961_v15 = vld [vmem:[%s4750_s5 + $0x20] sm:$0xff]  }
 0x183   : > { %v1136_v41 = vpack.c.bf16 %v849_v3, %v846_v59  ;;  %v1205_v5 = vsel %vm1140_vm0, %v1129_v62, 0  ;;  %v1134_v50 = vpack.c.bf16 %v833_v38, %v830_v19  ;;  %2815 = vmatprep.subr.bf16.mxu0 %v2959_v8  ;;  %v2965_v3 = vld [vmem:[%s4750_s5] sm:$0xff]  }
 0x184   : > { %v1193_v22 = vsel %vm1140_vm0, %v4817_v4, 0  ;;  %v1190_v55 = vsel %vm1140_vm0, %v4819_v7, 0  ;;  %v536_v13 = vpop.f32.mrf.mxu0  ;;  %2816 = vmatpush3.bf16.msra.mxu0 %v2959_v8 }
 0x185   : > { %2817 = vmatprep.subr.bf16.mxu0 %v2960_v60  ;;  %v537_v44 = vadd.f32 %v3633_v1, %v536_v13 }
 0x186   : > { %v2743_v14 = vpop.f32.mrf.mxu0 }
 0x187   : > { %v558_v18 = vadd.f32 %v2743_v14, %v3633_v1 }
 0x188   : > { %2560 = vmatpush3.bf16.xpose.msra.mxu1 %v1208_v45  ;;  %2818 = vmatpush3.bf16.msra.mxu0 %v2960_v60  ;;  %v549_v61 = vpop.f32.mrf.mxu0  ;;  %v545_v45 = vadd.f32 %v2740_v10, %v3633_v1 }
 0x189   : > { %2879 = vmatprep.subr.msk.bf16.mxu1 %vm1140_vm0, %v1137_v35  ;;  %2819 = vmatprep.subr.bf16.mxu0 %v2961_v15  ;;  %v542_v35 = vadd.f32 %v2739_v28, %v3633_v1  ;;  %v550_v59 = vadd.f32 %v3633_v1, %v549_v61 }
 0x18a   : > { %v2744_v30 = vpop.f32.mrf.mxu0 }
 0x18b   : > { %v561_v32 = vadd.f32 %v2744_v30, %v3633_v1 }
 0x18c   : > { %2820 = vmatpush3.bf16.msra.mxu0 %v2961_v15  ;;  %v552_v62 = vpop.f32.mrf.mxu0 }
 0x18d   : > { %2821 = vmatprep.subr.bf16.mxu0 %v2962_v39  ;;  %v553_v52 = vadd.f32 %v3633_v1, %v552_v62 }
 0x190   : > { %2562 = vmatpush3.bf16.xpose.msra.mxu1 %v1205_v5  ;;  %2822 = vmatpush3.bf16.msra.mxu0 %v2962_v39  ;;  %v1112_v5 = vpack.c.bf16 %v553_v52, %v550_v59 }
 0x191   : > { %2880 = vmatprep.subr.msk.bf16.mxu1 %vm1140_vm0, %v1136_v41  ;;  %2823 = vmatprep.subr.bf16.mxu0 %v2963_v17  ;;  %v2747_v41 = vpop.f32.mrf.mxu0 }
 0x193   : > { %v565_v37 = vpop.f32.mrf.mxu0 }
 0x194   : > { %2824 = vmatpush3.bf16.msra.mxu0 %v2963_v17  ;;  %v566_v38 = vadd.f32 %v3633_v1, %v565_v37 }
 0x195   : > { %2825 = vmatprep.subr.bf16.mxu0 %v2964_v46  ;;  %v2748_v25 = vpop.f32.mrf.mxu0 }
 0x198   : > { %2564 = vmatpush3.bf16.xpose.msra.mxu1 %v1202_v49  ;;  %2826 = vmatpush3.bf16.msra.mxu0 %v2964_v46  ;;  %v568_v49 = vpop.f32.mrf.mxu0  ;;  %v3964_v46 = vld [vmem:[%s4751_s6] ss:$0 sm:$0xff] }
 0x199   : > { %2881 = vmatprep.subr.msk.bf16.mxu1 %vm1140_vm0, %v1135_v53  ;;  %2827 = vmatprep.subr.bf16.mxu0 %v2965_v3  ;;  %v1113_v53 = vpack.c.bf16 %v561_v32, %v558_v18  ;;  %v569_v19 = vadd.f32 %v3633_v1, %v568_v49 }
 0x19c   : > { %2828 = vmatpush3.bf16.msra.mxu0 %v2965_v3 }
 0x19f   : > { %2830 = vmatmul.mubr.bf16.vlgmr.msra.gmra.mxu0 %v3538_v26  ;;  %v574_v26 = vadd.f32 %v2747_v41, %v3633_v1 }
 0x1a0   : > { %2566 = vmatpush3.bf16.xpose.msra.mxu1 %v1199_v58  ;;  %2833 = vmatprep.mubr.bf16.mxu0 %v3543_v29  ;;  %v577_v29 = vadd.f32 %v2748_v25, %v3633_v1 }
 0x1a1   : > { %2882 = vmatprep.subr.msk.bf16.mxu1 %vm1140_vm0, %v1134_v50  ;;  %v1114_v50 = vpack.c.bf16 %v569_v19, %v566_v38 }
 0x1a2   : > { %v1115_v36 = vpack.c.bf16 %v577_v29, %v574_v26 }
 0x1a7   : > { %2834 = vmatmul.mubr.bf16.gmra.mxu0 %v3564_v40 }
 0x1a8   : > { %2568 = vmatpush3.bf16.xpose.msra.mxu1 %v1196_v11  ;;  %2837 = vmatprep.mubr.bf16.mxu0 %v3569_v43 }
 0x1a9   : > { %2883 = vmatprep.subr.msk.bf16.mxu1 %vm1140_vm0, %v4816_v16 }
 0x1af   : > { %2838 = vmatmul.mubr.bf16.gmra.mxu0 %v3590_v54 }
 0x1b0   : > { %2570 = vmatpush3.bf16.xpose.msra.mxu1 %v1193_v22  ;;  %2841 = vmatprep.mubr.bf16.mxu0 %v3595_v57 }
 0x1b1   : > { %2884 = vmatprep.subr.msk.bf16.mxu1 %vm1140_vm0, %v4818_v24 }
 0x1b7   : > { %2842 = vmatmul.mubr.bf16.gmra.mxu0 %v3610_v63 }
 0x1b8   : > { %2572 = vmatpush3.bf16.xpose.msra.mxu1 %v1190_v55  ;;  %2845 = vmatprep.mubr.bf16.mxu0 %v3499_v6  ;;  %v4820_v6 = vld [vmem:[#allocation13_spill] sm:$0xff] }
 0x1bf   : > { %2574 = vmatmul.mubr.msk.bf16.vlgmr.msra.gmra.mxu1 %vm1140_vm0, %v3663_v51  ;;  %v1110_v51 = vpack.c.bf16 %v537_v44, %v534_v0  ;;  %2846 = vmatmul.mubr.bf16.gmra.mxu0 %v3528_v21  ;;  %v4821_v21 = vld [vmem:[#allocation15_spill] sm:$0xff] }
 0x1c0   : > { %2575 = vmatprep.mubr.msk.bf16.mxu1 %vm1140_vm0, %v3656_v42  ;;  %2849 = vmatprep.mubr.bf16.mxu0 %v3533_v23  ;;  %v4822_v23 = vld [vmem:[#allocation14_spill] sm:$0xff] }
 0x1c7   : > { %2576 = vmatmul.mubr.msk.bf16.gmra.mxu1 %vm1140_vm0, %v3656_v42  ;;  %v1111_v42 = vpack.c.bf16 %v545_v45, %v542_v35  ;;  %2850 = vmatmul.mubr.bf16.gmra.mxu0 %v3552_v33  ;;  %v4823_v33 = vld [vmem:[#allocation17_spill] sm:$0xff] }
 0x1c8   : > { %2577 = vmatprep.mubr.msk.bf16.mxu1 %vm1140_vm0, %v1110_v51  ;;  %2853 = vmatprep.mubr.bf16.mxu0 %v3554_v34  ;;  %v4824_v34 = vld [vmem:[#allocation16_spill] sm:$0xff] }
 0x1cf   : > { %2578 = vmatmul.mubr.msk.bf16.gmra.mxu1 %vm1140_vm0, %v1110_v51  ;;  %2854 = vmatmul.mubr.bf16.gmra.mxu0 %v3578_v47 }
 0x1d0   : > { %2579 = vmatprep.mubr.msk.bf16.mxu1 %vm1140_vm0, %v1111_v42  ;;  %2857 = vmatprep.mubr.bf16.mxu0 %v3580_v48 }
 0x1d7   : > { %2580 = vmatmul.mubr.msk.bf16.gmra.mxu1 %vm1140_vm0, %v1111_v42  ;;  %2858 = vmatmul.mubr.bf16.gmra.mxu0 %v4820_v6 }
 0x1d8   : > { %2581 = vmatprep.mubr.msk.bf16.mxu1 %vm1140_vm0, %v1112_v5 }
 0x1df   : > { %2582 = vmatmul.mubr.msk.bf16.gmra.mxu1 %vm1140_vm0, %v1112_v5 }
 0x1e0   : > { %2583 = vmatprep.mubr.msk.bf16.mxu1 %vm1140_vm0, %v1113_v53 }
 0x1e7   : > { %2584 = vmatmul.mubr.msk.bf16.gmra.mxu1 %vm1140_vm0, %v1113_v53 }
 0x1e8   : > { %2585 = vmatprep.mubr.msk.bf16.mxu1 %vm1140_vm0, %v1114_v50 }
 0x1ef   : > { %2586 = vmatmul.mubr.msk.bf16.gmra.mxu1 %vm1140_vm0, %v1114_v50 }
 0x1f0   : > { %2587 = vmatprep.mubr.msk.bf16.mxu1 %vm1140_vm0, %v1115_v36 }
 0x1f7   : > { %2588 = vmatmul.mubr.msk.bf16.gmra.mxu1 %vm1140_vm0, %v1115_v36 }
 0x1f8   : > { %2589 = vmatprep.mubr.msk.bf16.mxu1 %vm1140_vm0, %v3641_v12 }
 0x1ff   : > { %2590 = vmatmul.mubr.msk.bf16.gmra.mxu1 %vm1140_vm0, %v3641_v12 }
 0x200   : > { %2591 = vmatprep.mubr.msk.bf16.mxu1 %vm1140_vm0, %v3638_v9 }
 0x207   : > { %2592 = vmatmul.mubr.msk.bf16.gmra.mxu1 %vm1140_vm0, %v3638_v9 }
 0x208   : > { %2593 = vmatprep.mubr.msk.bf16.mxu1 %vm1140_vm0, %v3649_v27 }
 0x20f   : > { %2594 = vmatmul.mubr.msk.bf16.gmra.mxu1 %vm1140_vm0, %v3649_v27 }
 0x210   : > { %2595 = vmatprep.mubr.msk.bf16.mxu1 %vm1140_vm0, %v3646_v20 }
 0x217   : > { %2596 = vmatmul.mubr.msk.bf16.gmra.mxu1 %vm1140_vm0, %v3646_v20 }
 0x218   : > { %2597 = vmatprep.mubr.msk.bf16.mxu1 %vm1140_vm0, %v4821_v21 }
 0x21f   : > { %2598 = vmatmul.mubr.msk.bf16.gmra.mxu1 %vm1140_vm0, %v4821_v21 }
 0x220   : > { %2599 = vmatprep.mubr.msk.bf16.mxu1 %vm1140_vm0, %v4822_v23 }
 0x227   : > { %2600 = vmatmul.mubr.msk.bf16.gmra.mxu1 %vm1140_vm0, %v4822_v23 }
 0x228   : > { %2601 = vmatprep.mubr.msk.bf16.mxu1 %vm1140_vm0, %v4823_v33 }
 0x22f   : > { %2602 = vmatmul.mubr.msk.bf16.gmra.mxu1 %vm1140_vm0, %v4823_v33 }
 0x230   : > { %2603 = vmatprep.mubr.msk.bf16.mxu1 %vm1140_vm0, %v4824_v34 }
 0x237   : > { %2604 = vmatmul.mubr.msk.bf16.gmra.mxu1 %vm1140_vm0, %v4824_v34 }
 0x25f   : > { %v2831_v35 = vpop.f32.mrf.mxu0 }
 0x260   : > { %v3969_v3 = vadd.f32 %v2831_v35, %v3964_v46 }
 0x261   : > { %v981_v62 = vpop.f32.mrf.mxu0 }
 0x262   : > { %v3974_v41 = vadd.f32 %v3964_v46, %v981_v62 }
 0x263   : > { %v2832_v52 = vpop.f32.mrf.mxu0 }
 0x264   : > { %v3977_v5 = vadd.f32 %v2832_v52, %v3964_v46 }
 0x265   : > { %v984_v18 = vpop.f32.mrf.mxu0 }
 0x266   : > { %v3986_v53 = vadd.f32 %v3964_v46, %v984_v18 }
 0x267   : > { %v2835_v38 = vpop.f32.mrf.mxu0 }
 0x268   : > { %v3997_v36 = vadd.f32 %v2835_v38, %v3964_v46 }
 0x269   : > { %v997_v26 = vpop.f32.mrf.mxu0 }
 0x26a   : > { %v4002_v23 = vadd.f32 %v3964_v46, %v997_v26 }
 0x26b   : > { %v2836_v21 = vpop.f32.mrf.mxu0 }
 0x26c   : > { %v4005_v33 = vadd.f32 %v2836_v21, %v3964_v46 }
 0x27f   : > { %v3885_v40 = vpop.f32.mrf.mxu1 }
 0x281   : > { %v3887_v43 = vpop.f32.mrf.mxu1 }
 0x282   : > { %v1430_v47 = vmax.f32 %v3885_v40, %v3887_v43 }
 0x283   : > { %v3891_v48 = vpop.f32.mrf.mxu1 }
 0x284   : > { %1431 = vmax.xlane.f32.xlu0 %v1430_v47  ;;  %v1000_v47 = vpop.f32.mrf.mxu0 }
 0x285   : > { %v3893_v54 = vpop.f32.mrf.mxu1 }
 0x286   : > { %v1433_v57 = vmax.f32 %v3891_v48, %v3893_v54 }
 0x287   : > { %v3897_v63 = vpop.f32.mrf.mxu1 }
 0x288   : > { %1434 = vmax.xlane.f32.xlu0 %v1433_v57 }
 0x289   : > { %v3899_v1 = vpop.f32.mrf.mxu1 }
 0x28a   : > { %v1436_v9 = vmax.f32 %v3897_v63, %v3899_v1 }
 0x28b   : > { %v3903_v12 = vpop.f32.mrf.mxu1 }
 0x28c   : > { %1437 = vmax.xlane.f32.xlu1 %v1436_v9 }
 0x28d   : > { %v3905_v20 = vpop.f32.mrf.mxu1 }
 0x28e   : > { %v1439_v27 = vmax.f32 %v3903_v12, %v3905_v20 }
 0x28f   : > { %v3909_v58 = vpop.f32.mrf.mxu1 }
 0x290   : > { %1440 = vmax.xlane.f32.xlu1 %v1439_v27  ;;  %v4014_v27 = vadd.f32 %v3964_v46, %v1000_v47 }
 0x291   : > { %v3911_v2 = vpop.f32.mrf.mxu1 }
 0x292   : > { %v1442_v11 = vmax.f32 %v3909_v58, %v3911_v2 }
 0x293   : > { %v3915_v16 = vpop.f32.mrf.mxu1 }
 0x294   : > { %1443 = vmax.xlane.f32.xlu0 %v1442_v11 }
 0x295   : > { %v3917_v4 = vpop.f32.mrf.mxu1 }
 0x296   : > { %v1445_v22 = vmax.f32 %v3915_v16, %v3917_v4 }
 0x297   : > { %v3921_v24 = vpop.f32.mrf.mxu1 }
 0x298   : > { %1446 = vmax.xlane.f32.xlu1 %v1445_v22  ;;  %v4018_v22 = vpop.f32.mrf.mxu0 }
 0x299   : > { %v3923_v28 = vpop.f32.mrf.mxu1 }
 0x29a   : > { %v1448_v31 = vmax.f32 %v3921_v24, %v3923_v28 }
 0x29b   : > { %v3927_v7 = vpop.f32.mrf.mxu1 }
 0x29c   : > { %1449 = vmax.xlane.f32.xlu0 %v1448_v31 }
 0x29d   : > { %v3929_v55 = vpop.f32.mrf.mxu1 }
 0x29e   : > { %v1451_v56 = vmax.f32 %v3927_v7, %v3929_v55 }
 0x29f   : > { %v3933_v8 = vpop.f32.mrf.mxu1 }
 0x2a0   : > { %1452 = vmax.xlane.f32.xlu1 %v1451_v56 }
 0x2a1   : > { %v3935_v10 = vpop.f32.mrf.mxu1 }
 0x2a2   : > { %v1454_v60 = vmax.f32 %v3933_v8, %v3935_v10 }
 0x2a3   : > { %v3939_v13 = vpop.f32.mrf.mxu1 }
 0x2a4   : > { %1455 = vmax.xlane.f32.xlu0 %v1454_v60  ;;  %v4024_v60 = vpop.f32.mrf.mxu0 }
 0x2a5   : > { %v3941_v15 = vpop.f32.mrf.mxu1 }
 0x2a6   : > { %v1457_v0 = vmax.f32 %v3939_v13, %v3941_v15 }
 0x2a7   : > { %v3945_v44 = vpop.f32.mrf.mxu1 }
 0x2a8   : > { %1458 = vmax.xlane.f32.xlu1 %v1457_v0 }
 0x2a9   : > { %v3947_v14 = vpop.f32.mrf.mxu1 }
 0x2aa   : > { %4825 = vst [vmem:[#allocation13_spill] sm:$0xff] %v3947_v14  ;;  %v1460_v39 = vmax.f32 %v3945_v44, %v3947_v14 }
 0x2ab   : > { %v3951_v51 = vpop.f32.mrf.mxu1 }
 0x2ac   : > { %4826 = vst [vmem:[#allocation15_spill] sm:$0xff] %v3951_v51  ;;  %1461 = vmax.xlane.f32.xlu0 %v1460_v39 }
 0x2ad   : > { %v3953_v61 = vpop.f32.mrf.mxu1 }
 0x2ae   : > { %4827 = vst [vmem:[#allocation14_spill] sm:$0xff] %v3953_v61  ;;  %v1463_v17 = vmax.f32 %v3951_v51, %v3953_v61 }
 0x2af   : > { %v3957_v30 = vpop.f32.mrf.mxu1 }
 0x2b0   : > { %4828 = vst [vmem:[#allocation17_spill] sm:$0xff] %v3957_v30  ;;  %1464 = vmax.xlane.f32.xlu1 %v1463_v17  ;;  %v4030_v17 = vpop.f32.mrf.mxu0 }
 0x2b1   : > { %v3959_v45 = vpop.f32.mrf.mxu1 }
 0x2b2   : > { %4829 = vst [vmem:[#allocation16_spill] sm:$0xff] %v3959_v45  ;;  %v1466_v42 = vmax.f32 %v3957_v30, %v3959_v45  ;;  %v4034_v62 = vpop.f32.mrf.mxu0 }
 0x2b3   : > { %v3971_v59 = vpop.f32.mrf.mxu1 }
 0x2b4   : > { %4830 = vst [vmem:[#allocation18_spill] sm:$0xff] %v3971_v59  ;;  %1467 = vmax.xlane.f32.xlu0 %v1466_v42  ;;  %v2843_v18 = vpop.f32.mrf.mxu0 }
 0x2b5   : > { %v3979_v37 = vpop.f32.mrf.mxu1 }
 0x2b6   : > { %4831 = vst [vmem:[#allocation19_spill] sm:$0xff] %v3979_v37  ;;  %v1469_v32 = vmax.f32 %v3971_v59, %v3979_v37  ;;  %v1029_v38 = vpop.f32.mrf.mxu0  ;;  %v1038_v37 = vadd.f32 %v2843_v18, %v3964_v46 }
 0x2b7   : > { %v3988_v49 = vpop.f32.mrf.mxu1  ;;  %v1030_v30 = vadd.f32 %v3964_v46, %v1029_v38  ;;  %v1025_v38 = vadd.f32 %v4030_v17, %v3964_v46 }
 0x2b8   : > { %4832 = vst [vmem:[#allocation20_spill] sm:$0xff] %v3988_v49  ;;  %1470 = vmax.xlane.f32.xlu1 %v1469_v32  ;;  %v2844_v21 = vpop.f32.mrf.mxu0 }
 0x2b9   : > { %v3992_v50 = vpop.f32.mrf.mxu1 }
 0x2ba   : > { %4833 = vst [vmem:[#allocation21_spill] sm:$0xff] %v3992_v50  ;;  %v1472_v29 = vmax.f32 %v3988_v49, %v3992_v50 }
 0x2bb   : > { %v3999_v6 = vpop.f32.mrf.mxu1 }
 0x2bc   : > { %4834 = vst [vmem:[#allocation22_spill] sm:$0xff] %v3999_v6  ;;  %1473 = vmax.xlane.f32.xlu0 %v1472_v29 }
 0x2bd   : > { %v4007_v34 = vpop.f32.mrf.mxu1 }
 0x2be   : > { %4835 = vst [vmem:[#allocation23_spill] sm:$0xff] %v4007_v34  ;;  %v1475_v57 = vmax.f32 %v3999_v6, %v4007_v34 }
 0x2bf   : > { %v4016_v11 = vpop.f32.mrf.mxu1 }
 0x2c0   : > { %4836 = vst [vmem:[#allocation24_spill] sm:$0xff] %v4016_v11  ;;  %1476 = vmax.xlane.f32.xlu1 %v1475_v57  ;;  %v1032_v57 = vpop.f32.mrf.mxu0 }
 0x2c1   : > { %v4022_v56 = vpop.f32.mrf.mxu1 }
 0x2c2   : > { %4837 = vst [vmem:[#allocation25_spill] sm:$0xff] %v4022_v56  ;;  %v1478_v0 = vmax.f32 %v4016_v11, %v4022_v56  ;;  %v4052_v25 = vpop.f32.mrf.mxu0 }
 0x2c3   : > { %v4028_v39 = vpop.f32.mrf.mxu1 }
 0x2c4   : > { %4838 = vst [vmem:[#allocation26_spill] sm:$0xff] %v4028_v39  ;;  %1479 = vmax.xlane.f32.xlu0 %v1478_v0  ;;  %v4056_v31 = vpop.f32.mrf.mxu0 }
 0x2c5   : > { %v4032_v35 = vpop.f32.mrf.mxu1 }
 0x2c6   : > { %4839 = vst [vmem:[#allocation27_spill] sm:$0xff] %v4032_v35  ;;  %v1481_v42 = vmax.f32 %v4028_v39, %v4032_v35 }
 0x2c7   : > { %v4038_v52 = vpop.f32.mrf.mxu1 }
 0x2c8   : > { %4840 = vst [vmem:[#allocation28_spill] sm:$0xff] %v4038_v52  ;;  %1482 = vmax.xlane.f32.xlu1 %v1481_v42 }
 0x2c9   : > { %v4040_v32 = vpop.f32.mrf.mxu1 }
 0x2ca   : > { %4841 = vst [vmem:[#allocation29_spill] sm:$0xff] %v4040_v32  ;;  %v1484_v26 = vmax.f32 %v4038_v52, %v4040_v32 }
 0x2cb   : > { %v4044_v29 = vpop.f32.mrf.mxu1 }
 0x2cc   : > { %4842 = vst [vmem:[#allocation30_spill] sm:$0xff] %v4044_v29  ;;  %1485 = vmax.xlane.f32.xlu0 %v1484_v26  ;;  %v4062_v26 = vpop.f32.mrf.mxu0 }
 0x2cd   : > { %v4046_v47 = vpop.f32.mrf.mxu1 }
 0x2ce   : > { %4843 = vst [vmem:[#allocation31_spill] sm:$0xff] %v4046_v47  ;;  %v1487_v0 = vmax.f32 %v4044_v29, %v4046_v47  ;;  %v4066_v47 = vpop.f32.mrf.mxu0 }
 0x2cf   : > { %v4050_v19 = vpop.f32.mrf.mxu1 }
 0x2d0   : > { %4844 = vst [vmem:[#allocation32_spill] sm:$0xff] %v4050_v19  ;;  %1488 = vmax.xlane.f32.xlu1 %v1487_v0  ;;  %v2851_v35 = vpop.f32.mrf.mxu0 }
 0x2d1   : > { %v4054_v42 = vpop.f32.mrf.mxu1 }
 0x2d2   : > { %4845 = vst [vmem:[#allocation33_spill] sm:$0xff] %v4054_v42  ;;  %v1490_v9 = vmax.f32 %v4050_v19, %v4054_v42  ;;  %v1061_v56 = vpop.f32.mrf.mxu0 }
 0x2d3   : > { %v4060_v32 = vpop.f32.mrf.mxu1 }
 0x2d4   : > { %4846 = vst [vmem:[#allocation34_spill] sm:$0xff] %v4060_v32  ;;  %1491 = vmax.xlane.f32.xlu0 %v1490_v9  ;;  %v2852_v9 = vpop.f32.mrf.mxu0 }
 0x2d5   : > { %v4064_v52 = vpop.f32.mrf.mxu1 }
 0x2d6   : > { %4847 = vst [vmem:[#allocation35_spill] sm:$0xff] %v4064_v52  ;;  %v1493_v29 = vmax.f32 %v4060_v32, %v4064_v52  ;;  %v1064_v34 = vpop.f32.mrf.mxu0 }
 0x2d7   : > { %v4070_v0 = vpop.f32.mrf.mxu1 }
 0x2d8   : > { %4848 = vst [vmem:[#allocation36_spill] sm:$0xff] %v4070_v0  ;;  %1494 = vmax.xlane.f32.xlu1 %v1493_v29  ;;  %v2855_v32 = vpop.f32.mrf.mxu0 }
 0x2d9   : > { %v4072_v39 = vpop.f32.mrf.mxu1 }
 0x2da   : > { %4849 = vst [vmem:[#allocation37_spill] sm:$0xff] %v4072_v39  ;;  %v1496_v42 = vmax.f32 %v4070_v0, %v4072_v39  ;;  %v1077_v6 = vpop.f32.mrf.mxu0  ;;  %v1041_v39 = vadd.f32 %v2844_v21, %v3964_v46 }
 0x2db   : > { %v4076_v19 = vpop.f32.mrf.mxu1 }
 0x2dc   : > { %4850 = vst [vmem:[#allocation38_spill] sm:$0xff] %v4076_v19  ;;  %1497 = vmax.xlane.f32.xlu0 %v1496_v42  ;;  %v2856_v29 = vpop.f32.mrf.mxu0  ;;  %v1949_v61 = vpack.c.bf16 %v1041_v39, %v1038_v37  ;;  %v1078_v39 = vadd.f32 %v3964_v46, %v1077_v6 }
 0x2dd   : > { %v4078_v11 = vpop.f32.mrf.mxu1 }
 0x2de   : > { %4851 = vst [vmem:[#allocation39_spill] sm:$0xff] %v4078_v11  ;;  %v1499_v52 = vmax.f32 %v4076_v19, %v4078_v11  ;;  %v1080_v50 = vpop.f32.mrf.mxu0  ;;  %v1033_v11 = vadd.f32 %v3964_v46, %v1032_v57  ;;  %v1089_v19 = vadd.f32 %v2856_v29, %v3964_v46 }
 0x2df   : > { %v1081_v57 = vadd.f32 %v3964_v46, %v1080_v50  ;;  %v1065_v50 = vadd.f32 %v3964_v46, %v1064_v34 }
 0x2e0   : > { %1500 = vmax.xlane.f32.xlu1 %v1499_v52  ;;  %v2859_v49 = vpop.f32.mrf.mxu0  ;;  %v1086_v52 = vadd.f32 %v2855_v32, %v3964_v46  ;;  %v1948_v37 = vpack.c.bf16 %v1033_v11, %v1030_v30  ;;  %v1073_v30 = vadd.f32 %v2852_v9, %v3964_v46  ;;  %v1054_v11 = vadd.f32 %v4052_v25, %v3964_v46 }
 0x2e1   : > { %v1102_v59 = vadd.f32 %v2859_v49, %v3964_v46  ;;  %v1022_v49 = vadd.f32 %v4018_v22, %v3964_v46  ;;  %v1070_v22 = vadd.f32 %v2851_v35, %v3964_v46  ;;  %v4852_v35 = vpack.c.bf16 %v4005_v33, %v3997_v36 }
 0x2e2   : > { %v1093_v0 = vpop.f32.mrf.mxu0  ;;  %v1955_v32 = vpack.c.bf16 %v1089_v19, %v1086_v52  ;;  %v1062_v19 = vadd.f32 %v3964_v46, %v1061_v56  ;;  %v1046_v56 = vadd.f32 %v3964_v46, %v4056_v31  ;;  %v4853_v25 = vpack.c.bf16 %v4014_v27, %v4002_v23 }
 0x2e3   : > { %v1094_v51 = vadd.f32 %v3964_v46, %v1093_v0  ;;  %v1049_v0 = vadd.f32 %v3964_v46, %v4066_v47  ;;  %v4854_v36 = vpack.c.bf16 %v3977_v5, %v3969_v3 }
 0x2e4   : > { %v2860_v42 = vpop.f32.mrf.mxu0  ;;  %v1952_v17 = vpack.c.bf16 %v1065_v50, %v1062_v19 }
 0x2e5   : > { %v1105_v45 = vadd.f32 %v2860_v42, %v3964_v46  ;;  %v1950_v9 = vpack.c.bf16 %v1049_v0, %v1046_v56 }
 0x2e6   : > { %v1096_v14 = vpop.f32.mrf.mxu0 }
 0x2e7   : > { %v1957_v18 = vpack.c.bf16 %v1105_v45, %v1102_v59  ;;  %v1097_v21 = vadd.f32 %v3964_v46, %v1096_v14  ;;  %v1014_v45 = vadd.f32 %v3964_v46, %v4024_v60  ;;  %v1947_v14 = vpack.c.bf16 %v1025_v38, %v1022_v49 }
 0x2e8   : > { %v1017_v59 = vadd.f32 %v3964_v46, %v4034_v62  ;;  %v1057_v60 = vadd.f32 %v4062_v26, %v3964_v46  ;;  %v4113_v62 = vpop.f32.mrf.mxu1  ;;  %v4855_v46 = vpack.c.bf16 %v3986_v53, %v3974_v41 }
 0x2e9   : > { %2605 = vmatprep.subr.bf16.mxu0 %v1957_v18  ;;  %v1956_v29 = vpack.c.bf16 %v1097_v21, %v1094_v51  ;;  %v1953_v51 = vpack.c.bf16 %v1073_v30, %v1070_v22 }
 0x2ea   : > { %2606 = vmatpush3.bf16.msra.mxu0 %v1949_v61  ;;  %v1954_v61 = vpack.c.bf16 %v1081_v57, %v1078_v39  ;;  %v1946_v6 = vpack.c.bf16 %v1017_v59, %v1014_v45  ;;  %v1951_v34 = vpack.c.bf16 %v1057_v60, %v1054_v11  ;;  %v4122_v26 = vpop.f32.mrf.mxu1 }
 0x2eb   : > { %2607 = vmatprep.subr.bf16.mxu0 %v1956_v29  ;;  %v1502_v56 = vmax.f32 %v4113_v62, %v4122_v26 }
 0x2ec   : > { %v4127_v33 = vpop.f32.mrf.mxu1 }
 0x2ee   : > { %2608 = vmatpush3.bf16.msra.mxu0 %v1948_v37  ;;  %v4132_v47 = vpop.f32.mrf.mxu1 }
 0x2ef   : > { %2609 = vmatprep.subr.bf16.mxu0 %v1955_v32 }
 0x2f0   : > { %v4136_v21 = vpop.f32.mrf.mxu1 }
 0x2f2   : > { %2610 = vmatpush3.bf16.msra.mxu0 %v1947_v14  ;;  %v4140_v38 = vpop.f32.mrf.mxu1 }
 0x2f3   : > { %2611 = vmatprep.subr.bf16.mxu0 %v1954_v61 }
 0x2f4   : > { %v4144_v57 = vpop.f32.mrf.mxu1 }
 0x2f6   : > { %2612 = vmatpush3.bf16.msra.mxu0 %v1946_v6  ;;  %v4148_v59 = vpop.f32.mrf.mxu1 }
 0x2f7   : > { %2613 = vmatprep.subr.bf16.mxu0 %v1953_v51 }
 0x2f8   : > { %v4158_v19 = vpop.f32.mrf.mxu1 }
 0x2fa   : > { %2614 = vmatpush3.bf16.msra.mxu0 %v4852_v35 }
 0x2fb   : > { %2615 = vmatprep.subr.bf16.mxu0 %v1952_v17 }
 0x2fe   : > { %2616 = vmatpush3.bf16.msra.mxu0 %v4853_v25 }
 0x2ff   : > { %2617 = vmatprep.subr.bf16.mxu0 %v1951_v34  ;;  %v4170_v34 = vpop.f32.mrf.mxu1 }
 0x302   : > { %2618 = vmatpush3.bf16.msra.mxu0 %v4854_v36 }
 0x303   : > { %2619 = vmatprep.subr.bf16.mxu0 %v1950_v9 }
 0x306   : > { %2620 = vmatpush3.bf16.msra.mxu0 %v4855_v46 }
 0x30d   : > { %v1432_v31 = vpop.xlane.xlu0 %1431 }
 0x30e   : > { %v1526_v23 = vsub.f32 %v3885_v40, %v1432_v31  ;;  %v1527_v27 = vsub.f32 %v3887_v43, %v1432_v31 }
 0x310   : > { %v1590_v42 = vmul.f32 1.442695, %v1526_v23  ;;  %v1592_v52 = vmul.f32 1.442695, %v1527_v27  ;;  %v1505_v23 = vmax.f32 %v4127_v33, %v4132_v47  ;;  %v4182_v27 = vpop.f32.mrf.mxu1 }
 0x311   : > { %v1435_v18 = vpop.xlane.xlu0 %1434 }
 0x312   : > { %2966 = vpow2.f32 %v1590_v42  ;;  %v1528_v3 = vsub.f32 %v3891_v48, %v1435_v18  ;;  %v1529_v5 = vsub.f32 %v3893_v54, %v1435_v18 }
 0x313   : > { %2968 = vpow2.f32 %v1592_v52 }
 0x314   : > { %v1594_v49 = vmul.f32 1.442695, %v1528_v3  ;;  %v1596_v41 = vmul.f32 1.442695, %v1529_v5 }
 0x315   : > { %v1438_v53 = vpop.xlane.xlu1 %1437 }
 0x316   : > { %2970 = vpow2.f32 %v1594_v49  ;;  %v1530_v40 = vsub.f32 %v3897_v63, %v1438_v53  ;;  %v1531_v43 = vsub.f32 %v3899_v1, %v1438_v53  ;;  %v4194_v53 = vpop.f32.mrf.mxu1 }
 0x317   : > { %2972 = vpow2.f32 %v1596_v41  ;;  %v1508_v41 = vmax.f32 %v4136_v21, %v4140_v38 }
 0x318   : > { %v1598_v37 = vmul.f32 1.442695, %v1530_v40  ;;  %v1600_v39 = vmul.f32 1.442695, %v1531_v43 }
 0x319   : > { %v1441_v32 = vpop.xlane.xlu1 %1440 }
 0x31a   : > { %2974 = vpow2.f32 %v1598_v37  ;;  %v1532_v48 = vsub.f32 %v3903_v12, %v1441_v32  ;;  %v1533_v54 = vsub.f32 %v3905_v20, %v1441_v32 }
 0x31b   : > { %2976 = vpow2.f32 %v1600_v39 }
 0x31c   : > { %v1602_v29 = vmul.f32 1.442695, %v1532_v48  ;;  %v1604_v45 = vmul.f32 1.442695, %v1533_v54  ;;  %v1511_v54 = vmax.f32 %v4144_v57, %v4148_v59 }
 0x31d   : > { %v1444_v14 = vpop.xlane.xlu0 %1443 }
 0x31e   : > { %2978 = vpow2.f32 %v1602_v29  ;;  %v1534_v63 = vsub.f32 %v3909_v58, %v1444_v14  ;;  %v1535_v1 = vsub.f32 %v3911_v2, %v1444_v14  ;;  %v4206_v29 = vpop.f32.mrf.mxu1 }
 0x31f   : > { %v4152_v22 = vpop.eup %2966  ;;  %2980 = vpow2.f32 %v1604_v45 }
 0x320   : > { %v4154_v30 = vpop.eup %2968  ;;  %v1606_v61 = vmul.f32 1.442695, %v1534_v63  ;;  %v1608_v12 = vmul.f32 1.442695, %v1535_v1 }
 0x321   : > { %v1447_v6 = vpop.xlane.xlu1 %1446  ;;  %v1718_v20 = vadd.f32 %v4154_v30, %v4152_v22 }
 0x322   : > { %2982 = vpow2.f32 %v1606_v61  ;;  %v1536_v51 = vsub.f32 %v3915_v16, %v1447_v6  ;;  %v1537_v58 = vsub.f32 %v3917_v4, %v1447_v6  ;;  %v1514_v6 = vmax.f32 %v4158_v19, %v4170_v34 }
 0x323   : > { %v4162_v50 = vpop.eup %2970  ;;  %2984 = vpow2.f32 %v1608_v12  ;;  %1719 = vadd.xlane.f32.xlu0 %v1718_v20  ;;  %v4218_v20 = vpop.f32.mrf.mxu1 }
 0x324   : > { %v4164_v2 = vpop.eup %2972  ;;  %v1610_v11 = vmul.f32 1.442695, %v1536_v51  ;;  %v1612_v60 = vmul.f32 1.442695, %v1537_v58 }
 0x325   : > { %v1450_v17 = vpop.xlane.xlu0 %1449  ;;  %v1721_v35 = vadd.f32 %v4164_v2, %v4162_v50 }
 0x326   : > { %2986 = vpow2.f32 %v1610_v11  ;;  %v1538_v16 = vsub.f32 %v3921_v24, %v1450_v17  ;;  %v1539_v4 = vsub.f32 %v3923_v28, %v1450_v17 }
 0x327   : > { %v4174_v0 = vpop.eup %2974  ;;  %2988 = vpow2.f32 %v1612_v60  ;;  %1722 = vadd.xlane.f32.xlu1 %v1721_v35  ;;  %1503 = vmax.xlane.f32.xlu0 %v1502_v56 }
 0x328   : > { %v4176_v25 = vpop.eup %2976  ;;  %v1614_v9 = vmul.f32 1.442695, %v1538_v16  ;;  %v1616_v36 = vmul.f32 1.442695, %v1539_v4  ;;  %v1517_v16 = vmax.f32 %v4182_v27, %v4194_v53  ;;  %v4230_v4 = vpop.f32.mrf.mxu1 }
 0x329   : > { %v1453_v31 = vpop.xlane.xlu1 %1452  ;;  %v1724_v46 = vadd.f32 %v4176_v25, %v4174_v0 }
 0x32a   : > { %2990 = vpow2.f32 %v1614_v9  ;;  %v1540_v24 = vsub.f32 %v3927_v7, %v1453_v31  ;;  %v1541_v28 = vsub.f32 %v3929_v55, %v1453_v31 }
 0x32b   : > { %v4186_v42 = vpop.eup %2978  ;;  %2992 = vpow2.f32 %v1616_v36  ;;  %1725 = vadd.xlane.f32.xlu0 %v1724_v46  ;;  %1506 = vmax.xlane.f32.xlu1 %v1505_v23  ;;  %v4858_v36 = vld [vmem:[#allocation14_spill] sm:$0xff] }
 0x32c   : > { %v4188_v52 = vpop.eup %2980  ;;  %v1618_v18 = vmul.f32 1.442695, %v1540_v24  ;;  %v1620_v3 = vmul.f32 1.442695, %v1541_v28 }
 0x32d   : > { %v1456_v5 = vpop.xlane.xlu0 %1455  ;;  %v1727_v49 = vadd.f32 %v4188_v52, %v4186_v42 }
 0x32e   : > { %2994 = vpow2.f32 %v1618_v18  ;;  %v1542_v7 = vsub.f32 %v3933_v8, %v1456_v5  ;;  %v1543_v55 = vsub.f32 %v3935_v10, %v1456_v5  ;;  %v1520_v5 = vmax.f32 %v4206_v29, %v4218_v20 }
 0x32f   : > { %v4198_v40 = vpop.eup %2982  ;;  %2996 = vpow2.f32 %v1620_v3  ;;  %1728 = vadd.xlane.f32.xlu1 %v1727_v49  ;;  %1509 = vmax.xlane.f32.xlu0 %v1508_v41  ;;  %v4242_v49 = vpop.f32.mrf.mxu1  ;;  %v4859_v41 = vld [vmem:[#allocation17_spill] sm:$0xff] }
 0x330   : > { %v4200_v43 = vpop.eup %2984  ;;  %v1622_v37 = vmul.f32 1.442695, %v1542_v7  ;;  %v1624_v39 = vmul.f32 1.442695, %v1543_v55  ;;  %v4860_v55 = vld [vmem:[#allocation16_spill] sm:$0xff] }
 0x331   : > { %v1459_v32 = vpop.xlane.xlu1 %1458  ;;  %v1730_v48 = vadd.f32 %v4200_v43, %v4198_v40 }
 0x332   : > { %2998 = vpow2.f32 %v1622_v37  ;;  %v1544_v8 = vsub.f32 %v3939_v13, %v1459_v32  ;;  %v1545_v10 = vsub.f32 %v3941_v15, %v1459_v32  ;;  %v4856_v15 = vld [vmem:[#allocation13_spill] sm:$0xff] }
 0x333   : > { %v4210_v45 = vpop.eup %2986  ;;  %3000 = vpow2.f32 %v1624_v39  ;;  %1731 = vadd.xlane.f32.xlu0 %v1730_v48  ;;  %1512 = vmax.xlane.f32.xlu1 %v1511_v54 }
 0x334   : > { %v4212_v14 = vpop.eup %2988  ;;  %v1626_v63 = vmul.f32 1.442695, %v1544_v8  ;;  %v1628_v1 = vmul.f32 1.442695, %v1545_v10  ;;  %v1523_v8 = vmax.f32 %v4230_v4, %v4242_v49 }
 0x335   : > { %v1462_v61 = vpop.xlane.xlu0 %1461  ;;  %v1733_v12 = vadd.f32 %v4212_v14, %v4210_v45 }
 0x336   : > { %3002 = vpow2.f32 %v1626_v63  ;;  %v1546_v13 = vsub.f32 %v3945_v44, %v1462_v61  ;;  %v1547_v51 = vsub.f32 %v4856_v15, %v1462_v61  ;;  %v4857_v44 = vld [vmem:[#allocation15_spill] sm:$0xff] }
 0x337   : > { %v4222_v58 = vpop.eup %2990  ;;  %3004 = vpow2.f32 %v1628_v1  ;;  %1734 = vadd.xlane.f32.xlu1 %v1733_v12  ;;  %1515 = vmax.xlane.f32.xlu0 %v1514_v6  ;;  %v4861_v1 = vld [vmem:[#allocation18_spill] sm:$0xff]  ;;  %v4862_v12 = vld [vmem:[#allocation19_spill] sm:$0xff] }
 0x338   : > { %v4224_v11 = vpop.eup %2992  ;;  %v1630_v60 = vmul.f32 1.442695, %v1546_v13  ;;  %v1632_v17 = vmul.f32 1.442695, %v1547_v51 }
 0x339   : > { %v1465_v35 = vpop.xlane.xlu1 %1464  ;;  %v1736_v56 = vadd.f32 %v4224_v11, %v4222_v58 }
 0x33a   : > { %3006 = vpow2.f32 %v1630_v60  ;;  %v1548_v9 = vsub.f32 %v4857_v44, %v1465_v35  ;;  %v1549_v31 = vsub.f32 %v4858_v36, %v1465_v35  ;;  %v4864_v44 = vld [vmem:[#allocation21_spill] sm:$0xff] }
 0x33b   : > { %v4234_v46 = vpop.eup %2994  ;;  %3008 = vpow2.f32 %v1632_v17  ;;  %1737 = vadd.xlane.f32.xlu0 %v1736_v56  ;;  %1518 = vmax.xlane.f32.xlu1 %v1517_v16  ;;  %v4863_v56 = vld [vmem:[#allocation20_spill] sm:$0xff] }
 0x33c   : > { %v4236_v23 = vpop.eup %2996  ;;  %v1634_v24 = vmul.f32 1.442695, %v1548_v9  ;;  %v1636_v28 = vmul.f32 1.442695, %v1549_v31 }
 0x33d   : > { %v1468_v18 = vpop.xlane.xlu0 %1467  ;;  %v1739_v3 = vadd.f32 %v4236_v23, %v4234_v46 }
 0x33e   : > { %3010 = vpow2.f32 %v1634_v24  ;;  %v1550_v7 = vsub.f32 %v4859_v41, %v1468_v18  ;;  %v1551_v37 = vsub.f32 %v4860_v55, %v1468_v18 }
 0x33f   : > { %v4246_v39 = vpop.eup %2998  ;;  %3012 = vpow2.f32 %v1636_v28  ;;  %1740 = vadd.xlane.f32.xlu1 %v1739_v3  ;;  %1521 = vmax.xlane.f32.xlu0 %v1520_v5  ;;  %v4865_v5 = vld [vmem:[#allocation22_spill] sm:$0xff] }
 0x340   : > { %v4248_v32 = vpop.eup %3000  ;;  %v1638_v48 = vmul.f32 1.442695, %v1550_v7  ;;  %v1640_v54 = vmul.f32 1.442695, %v1551_v37  ;;  %v4866_v7 = vld [vmem:[#allocation23_spill] sm:$0xff] }
 0x341   : > { %v1471_v10 = vpop.xlane.xlu1 %1470  ;;  %v1742_v63 = vadd.f32 %v4248_v32, %v4246_v39 }
 0x342   : > { %3014 = vpow2.f32 %v1638_v48  ;;  %v1552_v61 = vsub.f32 %v4861_v1, %v1471_v10  ;;  %v1553_v6 = vsub.f32 %v4862_v12, %v1471_v10  ;;  %v4867_v1 = vld [vmem:[#allocation24_spill] sm:$0xff]  ;;  %v4868_v12 = vld [vmem:[#allocation25_spill] sm:$0xff] }
 0x343   : > { %v4256_v13 = vpop.eup %3002  ;;  %3016 = vpow2.f32 %v1640_v54  ;;  %1743 = vadd.xlane.f32.xlu0 %v1742_v63  ;;  %1524 = vmax.xlane.f32.xlu1 %v1523_v8 }
 0x344   : > { %v4258_v15 = vpop.eup %3004  ;;  %v1642_v51 = vmul.f32 1.442695, %v1552_v61  ;;  %v1644_v60 = vmul.f32 1.442695, %v1553_v6 }
 0x345   : > { %v1474_v17 = vpop.xlane.xlu0 %1473  ;;  %v1745_v35 = vadd.f32 %v4258_v15, %v4256_v13 }
 0x346   : > { %3018 = vpow2.f32 %v1642_v51  ;;  %v1554_v16 = vsub.f32 %v4863_v56, %v1474_v17  ;;  %v1555_v9 = vsub.f32 %v4864_v44, %v1474_v17  ;;  %v4869_v44 = vld [vmem:[#allocation26_spill] sm:$0xff] }
 0x347   : > { %v4264_v36 = vpop.eup %3006  ;;  %3020 = vpow2.f32 %v1644_v60  ;;  %1746 = vadd.xlane.f32.xlu1 %v1745_v35 }
 0x348   : > { %v4266_v31 = vpop.eup %3008  ;;  %v1646_v24 = vmul.f32 1.442695, %v1554_v16  ;;  %v1648_v28 = vmul.f32 1.442695, %v1555_v9 }
 0x349   : > { %v1477_v18 = vpop.xlane.xlu1 %1476  ;;  %v1748_v3 = vadd.f32 %v4266_v31, %v4264_v36 }
 0x34a   : > { %3022 = vpow2.f32 %v1646_v24  ;;  %v1556_v41 = vsub.f32 %v4865_v5, %v1477_v18  ;;  %v1557_v55 = vsub.f32 %v4866_v7, %v1477_v18  ;;  %v4870_v24 = vld [vmem:[#allocation27_spill] sm:$0xff] }
 0x34b   : > { %v4272_v37 = vpop.eup %3010  ;;  %3024 = vpow2.f32 %v1648_v28  ;;  %1749 = vadd.xlane.f32.xlu0 %v1748_v3 }
 0x34c   : > { %v4274_v48 = vpop.eup %3012  ;;  %v1650_v54 = vmul.f32 1.442695, %v1556_v41  ;;  %v1652_v8 = vmul.f32 1.442695, %v1557_v55 }
 0x34d   : > { %v1480_v10 = vpop.xlane.xlu0 %1479  ;;  %v1751_v63 = vadd.f32 %v4274_v48, %v4272_v37 }
 0x34e   : > { %3026 = vpow2.f32 %v1650_v54  ;;  %v1558_v61 = vsub.f32 %v4867_v1, %v1480_v10  ;;  %v1559_v6 = vsub.f32 %v4868_v12, %v1480_v10  ;;  %v4871_v54 = vld [vmem:[#allocation28_spill] sm:$0xff]  ;;  %v4872_v10 = vld [vmem:[#allocation29_spill] sm:$0xff] }
 0x34f   : > { %v4280_v51 = vpop.eup %3014  ;;  %3028 = vpow2.f32 %v1652_v8  ;;  %1752 = vadd.xlane.f32.xlu1 %v1751_v63 }
 0x350   : > { %v4282_v60 = vpop.eup %3016  ;;  %v1654_v17 = vmul.f32 1.442695, %v1558_v61  ;;  %v1656_v35 = vmul.f32 1.442695, %v1559_v6 }
 0x351   : > { %v1483_v56 = vpop.xlane.xlu1 %1482  ;;  %v1754_v16 = vadd.f32 %v4282_v60, %v4280_v51 }
 0x352   : > { %3030 = vpow2.f32 %v1654_v17  ;;  %v1560_v9 = vsub.f32 %v4869_v44, %v1483_v56  ;;  %v1561_v28 = vsub.f32 %v4870_v24, %v1483_v56  ;;  %v4873_v56 = vld [vmem:[#allocation30_spill] sm:$0xff]  ;;  %v4874_v44 = vld [vmem:[#allocation31_spill] sm:$0xff] }
 0x353   : > { %v4288_v18 = vpop.eup %3018  ;;  %3032 = vpow2.f32 %v1656_v35  ;;  %1755 = vadd.xlane.f32.xlu0 %v1754_v16 }
 0x354   : > { %v4290_v3 = vpop.eup %3020  ;;  %v1658_v5 = vmul.f32 1.442695, %v1560_v9  ;;  %v1660_v41 = vmul.f32 1.442695, %v1561_v28 }
 0x355   : > { %v1486_v7 = vpop.xlane.xlu0 %1485  ;;  %v1757_v55 = vadd.f32 %v4290_v3, %v4288_v18 }
 0x356   : > { %3034 = vpow2.f32 %v1658_v5  ;;  %v1562_v8 = vsub.f32 %v4871_v54, %v1486_v7  ;;  %v1563_v63 = vsub.f32 %v4872_v10, %v1486_v7  ;;  %v4876_v54 = vld [vmem:[#allocation32_spill] sm:$0xff]  ;;  %v4877_v10 = vld [vmem:[#allocation33_spill] sm:$0xff] }
 0x357   : > { %v4296_v1 = vpop.eup %3022  ;;  %3036 = vpow2.f32 %v1660_v41  ;;  %1758 = vadd.xlane.f32.xlu1 %v1757_v55 }
 0x358   : > { %v4298_v61 = vpop.eup %3024  ;;  %v1662_v12 = vmul.f32 1.442695, %v1562_v8  ;;  %v1664_v6 = vmul.f32 1.442695, %v1563_v63 }
 0x359   : > { %v1489_v17 = vpop.xlane.xlu1 %1488  ;;  %v1760_v35 = vadd.f32 %v4298_v61, %v4296_v1 }
 0x35a   : > { %3038 = vpow2.f32 %v1662_v12  ;;  %v1564_v16 = vsub.f32 %v4873_v56, %v1489_v17  ;;  %v1565_v9 = vsub.f32 %v4874_v44, %v1489_v17  ;;  %v4880_v44 = vld [vmem:[#allocation34_spill] sm:$0xff] }
 0x35b   : > { %v4304_v24 = vpop.eup %3026  ;;  %3040 = vpow2.f32 %v1664_v6  ;;  %1761 = vadd.xlane.f32.xlu0 %v1760_v35 }
 0x35c   : > { %4875 = vst [vmem:[#allocation13_spill] sm:$0xff] %v4304_v24  ;;  %v4306_v28 = vpop.eup %3028  ;;  %v1666_v5 = vmul.f32 1.442695, %v1564_v16  ;;  %v1668_v41 = vmul.f32 1.442695, %v1565_v9 }
 0x35d   : > { %v1492_v7 = vpop.xlane.xlu0 %1491  ;;  %v1763_v55 = vadd.f32 %v4306_v28, %v4304_v24 }
 0x35e   : > { %3042 = vpow2.f32 %v1666_v5  ;;  %v1566_v8 = vsub.f32 %v4876_v54, %v1492_v7  ;;  %v1567_v63 = vsub.f32 %v4877_v10, %v1492_v7  ;;  %v4881_v5 = vld [vmem:[#allocation35_spill] sm:$0xff] }
 0x35f   : > { %v4312_v12 = vpop.eup %3030  ;;  %3044 = vpow2.f32 %v1668_v41  ;;  %1764 = vadd.xlane.f32.xlu1 %v1763_v55 }
 0x360   : > { %4878 = vst [vmem:[#allocation15_spill] sm:$0xff] %v4312_v12  ;;  %v4314_v17 = vpop.eup %3032  ;;  %v1670_v6 = vmul.f32 1.442695, %v1566_v8  ;;  %v1672_v35 = vmul.f32 1.442695, %v1567_v63  ;;  %v4884_v63 = vld [vmem:[#allocation36_spill] sm:$0xff] }
 0x361   : > { %4879 = vst [vmem:[#allocation14_spill] sm:$0xff] %v4314_v17  ;;  %v1495_v56 = vpop.xlane.xlu1 %1494  ;;  %v1766_v16 = vadd.f32 %v4314_v17, %v4312_v12 }
 0x362   : > { %3046 = vpow2.f32 %v1670_v6  ;;  %v1568_v9 = vsub.f32 %v4880_v44, %v1495_v56  ;;  %v1569_v24 = vsub.f32 %v4881_v5, %v1495_v56  ;;  %v4885_v6 = vld [vmem:[#allocation37_spill] sm:$0xff] }
 0x363   : > { %v4320_v54 = vpop.eup %3034  ;;  %3048 = vpow2.f32 %v1672_v35  ;;  %1767 = vadd.xlane.f32.xlu0 %v1766_v16 }
 0x364   : > { %4882 = vst [vmem:[#allocation17_spill] sm:$0xff] %v4320_v54  ;;  %v4322_v7 = vpop.eup %3036  ;;  %v1674_v41 = vmul.f32 1.442695, %v1568_v9  ;;  %v1676_v55 = vmul.f32 1.442695, %v1569_v24  ;;  %v4886_v9 = vld [vmem:[#allocation38_spill] sm:$0xff] }
 0x365   : > { %4883 = vst [vmem:[#allocation16_spill] sm:$0xff] %v4322_v7  ;;  %v1498_v10 = vpop.xlane.xlu0 %1497  ;;  %v1769_v8 = vadd.f32 %v4322_v7, %v4320_v54 }
 0x366   : > { %3050 = vpow2.f32 %v1674_v41  ;;  %v1570_v12 = vsub.f32 %v4884_v63, %v1498_v10  ;;  %v1571_v17 = vsub.f32 %v4885_v6, %v1498_v10  ;;  %v4887_v41 = vld [vmem:[#allocation39_spill] sm:$0xff] }
 0x367   : > { %v4328_v44 = vpop.eup %3038  ;;  %3052 = vpow2.f32 %v1676_v55  ;;  %1770 = vadd.xlane.f32.xlu1 %v1769_v8 }
 0x368   : > { %v4330_v56 = vpop.eup %3040  ;;  %v1678_v35 = vmul.f32 1.442695, %v1570_v12  ;;  %v1680_v16 = vmul.f32 1.442695, %v1571_v17 }
 0x369   : > { %v1501_v5 = vpop.xlane.xlu1 %1500  ;;  %v1772_v24 = vadd.f32 %v4330_v56, %v4328_v44 }
 0x36a   : > { %3054 = vpow2.f32 %v1678_v35  ;;  %v1572_v54 = vsub.f32 %v4886_v9, %v1501_v5  ;;  %v1573_v7 = vsub.f32 %v4887_v41, %v1501_v5 }
 0x36b   : > { %v4336_v63 = vpop.eup %3042  ;;  %3056 = vpow2.f32 %v1680_v16  ;;  %1773 = vadd.xlane.f32.xlu0 %v1772_v24 }
 0x36c   : > { %v4338_v10 = vpop.eup %3044  ;;  %v1682_v55 = vmul.f32 1.442695, %v1572_v54  ;;  %v1684_v8 = vmul.f32 1.442695, %v1573_v7 }
 0x36d   : > { %v1775_v12 = vadd.f32 %v4338_v10, %v4336_v63 }
 0x36e   : > { %3058 = vpow2.f32 %v1682_v55 }
 0x36f   : > { %v4342_v17 = vpop.eup %3046  ;;  %3060 = vpow2.f32 %v1684_v8  ;;  %1776 = vadd.xlane.f32.xlu1 %v1775_v12 }
 0x370   : > { %4888 = vst [vmem:[#allocation18_spill] sm:$0xff] %v4342_v17  ;;  %v4344_v6 = vpop.eup %3048 }
 0x371   : > { %4889 = vst [vmem:[#allocation19_spill] sm:$0xff] %v4344_v6  ;;  %v1778_v35 = vadd.f32 %v4344_v6, %v4342_v17 }
 0x373   : > { %v4348_v5 = vpop.eup %3050  ;;  %1779 = vadd.xlane.f32.xlu0 %v1778_v35 }
 0x374   : > { %4890 = vst [vmem:[#allocation20_spill] sm:$0xff] %v4348_v5  ;;  %v4350_v16 = vpop.eup %3052 }
 0x375   : > { %4891 = vst [vmem:[#allocation21_spill] sm:$0xff] %v4350_v16  ;;  %v1781_v54 = vadd.f32 %v4350_v16, %v4348_v5 }
 0x377   : > { %v4354_v7 = vpop.eup %3054  ;;  %1782 = vadd.xlane.f32.xlu1 %v1781_v54 }
 0x378   : > { %4892 = vst [vmem:[#allocation22_spill] sm:$0xff] %v4354_v7  ;;  %v4356_v24 = vpop.eup %3056 }
 0x379   : > { %4893 = vst [vmem:[#allocation23_spill] sm:$0xff] %v4356_v24  ;;  %v1784_v9 = vadd.f32 %v4356_v24, %v4354_v7 }
 0x37b   : > { %v4360_v41 = vpop.eup %3058  ;;  %1785 = vadd.xlane.f32.xlu0 %v1784_v9 }
 0x37c   : > { %4894 = vst [vmem:[#allocation24_spill] sm:$0xff] %v4360_v41  ;;  %v4362_v55 = vpop.eup %3060 }
 0x37d   : > { %4895 = vst [vmem:[#allocation25_spill] sm:$0xff] %v4362_v55  ;;  %v1787_v8 = vadd.f32 %v4362_v55, %v4360_v41 }
 0x37f   : > { %1788 = vadd.xlane.f32.xlu1 %v1787_v8 }
 0x3ac   : > { %v1720_v12 = vpop.xlane.xlu0 %1719 }
 0x3ad   : > { %3062 = vrcp.f32 %v1720_v12 }
 0x3b0   : > { %v1723_v35 = vpop.xlane.xlu1 %1722  ;;  %v1504_v5 = vpop.xlane.xlu0 %1503 }
 0x3b1   : > { %3064 = vrcp.f32 %v1723_v35  ;;  %v1574_v54 = vsub.f32 %v4113_v62, %v1504_v5  ;;  %v1575_v16 = vsub.f32 %v4122_v26, %v1504_v5 }
 0x3b3   : > { %v1686_v7 = vmul.f32 1.442695, %v1574_v54  ;;  %v1688_v24 = vmul.f32 1.442695, %v1575_v16 }
 0x3b4   : > { %v1726_v17 = vpop.xlane.xlu0 %1725  ;;  %v1507_v9 = vpop.xlane.xlu1 %1506 }
 0x3b5   : > { %3066 = vpow2.f32 %v1686_v7  ;;  %v1576_v6 = vsub.f32 %v4127_v33, %v1507_v9  ;;  %v1577_v41 = vsub.f32 %v4132_v47, %v1507_v9 }
 0x3b6   : > { %3068 = vpow2.f32 %v1688_v24 }
 0x3b7   : > { %3070 = vrcp.f32 %v1726_v17  ;;  %v1690_v8 = vmul.f32 1.442695, %v1576_v6  ;;  %v1692_v12 = vmul.f32 1.442695, %v1577_v41 }
 0x3b8   : > { %v1729_v55 = vpop.xlane.xlu1 %1728  ;;  %v1510_v35 = vpop.xlane.xlu0 %1509 }
 0x3b9   : > { %3072 = vpow2.f32 %v1690_v8  ;;  %v1578_v62 = vsub.f32 %v4136_v21, %v1510_v35  ;;  %v1579_v26 = vsub.f32 %v4140_v38, %v1510_v35 }
 0x3ba   : > { %v3063_v5 = vpop.eup %3062  ;;  %3074 = vpow2.f32 %v1692_v12 }
 0x3bb   : > { %3076 = vrcp.f32 %v1729_v55  ;;  %v1694_v16 = vmul.f32 1.442695, %v1578_v62  ;;  %v1696_v7 = vmul.f32 1.442695, %v1579_v26  ;;  %v1847_v33 = vmul.f32 %v3063_v5, %v4154_v30 }
 0x3bc   : > { %v1732_v47 = vpop.xlane.xlu0 %1731  ;;  %v1513_v24 = vpop.xlane.xlu1 %1512  ;;  %v1846_v17 = vmul.f32 %v3063_v5, %v4152_v22 }
 0x3bd   : > { %3078 = vpow2.f32 %v1694_v16  ;;  %v1580_v6 = vsub.f32 %v4144_v57, %v1513_v24  ;;  %v1581_v41 = vsub.f32 %v4148_v59, %v1513_v24  ;;  %2218 = vst [vmem:[%s4377_s29 + $0x8] sm:$0xff] %v1847_v33 }
 0x3be   : > { %v3065_v21 = vpop.eup %3064  ;;  %3080 = vpow2.f32 %v1696_v7  ;;  %2217 = vst [vmem:[%s4377_s29] sm:$0xff] %v1846_v17 }
 0x3bf   : > { %3082 = vrcp.f32 %v1732_v47  ;;  %v1698_v38 = vmul.f32 1.442695, %v1580_v6  ;;  %v1700_v30 = vmul.f32 1.442695, %v1581_v41  ;;  %v1849_v22 = vmul.f32 %v3065_v21, %v4164_v2 }
 0x3c0   : > { %v1735_v55 = vpop.xlane.xlu1 %1734  ;;  %v1516_v54 = vpop.xlane.xlu0 %1515  ;;  %v1848_v57 = vmul.f32 %v3065_v21, %v4162_v50 }
 0x3c1   : > { %3084 = vpow2.f32 %v1698_v38  ;;  %v1582_v59 = vsub.f32 %v4158_v19, %v1516_v54  ;;  %v1583_v9 = vsub.f32 %v4170_v34, %v1516_v54  ;;  %v1911_v8 = vpack.c.bf16 %v1849_v22, %v1847_v33  ;;  %2220 = vst [vmem:[%s4377_s29 + $0x18] sm:$0xff] %v1849_v22 }
 0x3c2   : > { %v4386_v12 = vpop.eup %3066  ;;  %3086 = vpow2.f32 %v1700_v30  ;;  %v1910_v35 = vpack.c.bf16 %v1848_v57, %v1846_v17  ;;  %2219 = vst [vmem:[%s4377_s29 + $0x10] sm:$0xff] %v1848_v57 }
 0x3c3   : > { %v4389_v62 = vpop.eup %3068  ;;  %3088 = vrcp.f32 %v1735_v55  ;;  %v1702_v2 = vmul.f32 1.442695, %v1582_v59  ;;  %v1704_v26 = vmul.f32 1.442695, %v1583_v9  ;;  %1990 = vmatprep.mubr.bf16.mxu0 %v1911_v8 }
 0x3c4   : > { %v3071_v5 = vpop.eup %3070  ;;  %1991 = vmatmul.mubr.bf16.vlgmr.msra.gmra.mxu0 %v1910_v35  ;;  %v1738_v50 = vpop.xlane.xlu0 %1737  ;;  %v1790_v34 = vadd.f32 %v4389_v62, %v4386_v12 }
 0x3c5   : > { %v1519_v19 = vpop.xlane.xlu1 %1518  ;;  %3090 = vpow2.f32 %v1702_v2  ;;  %v1851_v33 = vmul.f32 %v3071_v5, %v4176_v25  ;;  %v1850_v24 = vmul.f32 %v3071_v5, %v4174_v0 }
 0x3c6   : > { %v1584_v16 = vsub.f32 %v4182_v27, %v1519_v19  ;;  %v1585_v7 = vsub.f32 %v4194_v53, %v1519_v19  ;;  %v4396_v47 = vpop.eup %3072  ;;  %3092 = vpow2.f32 %v1704_v26  ;;  %1791 = vadd.xlane.f32.xlu0 %v1790_v34 }
 0x3c7   : > { %v4399_v17 = vpop.eup %3074  ;;  %3094 = vrcp.f32 %v1738_v50  ;;  %2222 = vst [vmem:[%s4377_s29 + $0x28] sm:$0xff] %v1851_v33  ;;  %2221 = vst [vmem:[%s4377_s29 + $0x20] sm:$0xff] %v1850_v24 }
 0x3c8   : > { %v1706_v6 = vmul.f32 1.442695, %v1584_v16  ;;  %v1708_v41 = vmul.f32 1.442695, %v1585_v7  ;;  %v3077_v21 = vpop.eup %3076  ;;  %v1522_v27 = vpop.xlane.xlu0 %1521  ;;  %v1793_v53 = vadd.f32 %v4399_v17, %v4396_v47 }
 0x3c9   : > { %v1741_v38 = vpop.xlane.xlu1 %1740  ;;  %v1586_v25 = vsub.f32 %v4206_v29, %v1522_v27  ;;  %v1587_v0 = vsub.f32 %v4218_v20, %v1522_v27  ;;  %v1853_v30 = vmul.f32 %v3077_v21, %v4188_v52  ;;  %v1852_v55 = vmul.f32 %v3077_v21, %v4186_v42 }
 0x3ca   : > { %3096 = vpow2.f32 %v1706_v6  ;;  %v4408_v22 = vpop.eup %3078  ;;  %1794 = vadd.xlane.f32.xlu1 %v1793_v53 }
 0x3cb   : > { %3098 = vpow2.f32 %v1708_v41  ;;  %v4411_v54 = vpop.eup %3080  ;;  %v1710_v57 = vmul.f32 1.442695, %v1586_v25  ;;  %v1712_v59 = vmul.f32 1.442695, %v1587_v0  ;;  %v1913_v9 = vpack.c.bf16 %v1853_v30, %v1851_v33  ;;  %2224 = vst [vmem:[%s4377_s29 + $0x38] sm:$0xff] %v1853_v30  ;;  %2223 = vst [vmem:[%s4377_s29 + $0x30] sm:$0xff] %v1852_v55 }
 0x3cc   : > { %3100 = vrcp.f32 %v1741_v38  ;;  %v3083_v8 = vpop.eup %3082  ;;  %v1912_v35 = vpack.c.bf16 %v1852_v55, %v1850_v24  ;;  %v1744_v29 = vpop.xlane.xlu0 %1743  ;;  %v1796_v52 = vadd.f32 %v4411_v54, %v4408_v22 }
 0x3cd   : > { %v1525_v20 = vpop.xlane.xlu1 %1524  ;;  %3102 = vpow2.f32 %v1710_v57  ;;  %1998 = vmatprep.mubr.bf16.mxu0 %v1913_v9  ;;  %v1855_v26 = vmul.f32 %v3083_v8, %v4200_v43  ;;  %v1854_v50 = vmul.f32 %v3083_v8, %v4198_v40 }
 0x3ce   : > { %v1588_v42 = vsub.f32 %v4230_v4, %v1525_v20  ;;  %v1589_v2 = vsub.f32 %v4242_v49, %v1525_v20  ;;  %v4420_v5 = vpop.eup %3084  ;;  %3104 = vpow2.f32 %v1712_v59  ;;  %1999 = vmatmul.mubr.bf16.gmra.mxu0 %v1912_v35  ;;  %1797 = vadd.xlane.f32.xlu0 %v1796_v52 }
 0x3cf   : > { %v4423_v19 = vpop.eup %3086  ;;  %3106 = vrcp.f32 %v1744_v29  ;;  %2226 = vst [vmem:[%s4377_s29 + $0x48] sm:$0xff] %v1855_v26  ;;  %2225 = vst [vmem:[%s4377_s29 + $0x40] sm:$0xff] %v1854_v50 }
 0x3d0   : > { %v1714_v34 = vmul.f32 1.442695, %v1588_v42  ;;  %v1716_v16 = vmul.f32 1.442695, %v1589_v2  ;;  %v3089_v4 = vpop.eup %3088  ;;  %v1799_v43 = vadd.f32 %v4423_v19, %v4420_v5 }
 0x3d1   : > { %v1747_v7 = vpop.xlane.xlu1 %1746  ;;  %v1857_v49 = vmul.f32 %v3089_v4, %v4212_v14  ;;  %v1856_v33 = vmul.f32 %v3089_v4, %v4210_v45 }
 0x3d2   : > { %3108 = vpow2.f32 %v1714_v34  ;;  %v4431_v40 = vpop.eup %3090  ;;  %1800 = vadd.xlane.f32.xlu1 %v1799_v43 }
 0x3d3   : > { %3110 = vpow2.f32 %v1716_v16  ;;  %v4433_v24 = vpop.eup %3092  ;;  %v1915_v6 = vpack.c.bf16 %v1857_v49, %v1855_v26  ;;  %2228 = vst [vmem:[%s4377_s29 + $0x58] sm:$0xff] %v1857_v49  ;;  %v1914_v41 = vpack.c.bf16 %v1856_v33, %v1854_v50  ;;  %2227 = vst [vmem:[%s4377_s29 + $0x50] sm:$0xff] %v1856_v33 }
 0x3d4   : > { %3112 = vrcp.f32 %v1747_v7  ;;  %v3095_v21 = vpop.eup %3094  ;;  %v1750_v38 = vpop.xlane.xlu0 %1749  ;;  %v1802_v14 = vadd.f32 %v4433_v24, %v4431_v40 }
 0x3d5   : > { %2006 = vmatprep.mubr.bf16.mxu0 %v1915_v6  ;;  %3114 = vrcp.f32 %v1750_v38  ;;  %v1859_v45 = vmul.f32 %v3095_v21, %v4224_v11  ;;  %v1858_v27 = vmul.f32 %v3095_v21, %v4222_v58 }
 0x3d6   : > { %2007 = vmatmul.mubr.bf16.gmra.mxu0 %v1914_v41  ;;  %1803 = vadd.xlane.f32.xlu0 %v1802_v14 }
 0x3d7   : > { %v4441_v53 = vpop.eup %3096  ;;  %2230 = vst [vmem:[%s4377_s29 + $0x68] sm:$0xff] %v1859_v45  ;;  %2229 = vst [vmem:[%s4377_s29 + $0x60] sm:$0xff] %v1858_v27 }
 0x3d8   : > { %v4443_v25 = vpop.eup %3098  ;;  %v1753_v30 = vpop.xlane.xlu1 %1752 }
 0x3d9   : > { %v3101_v0 = vpop.eup %3100  ;;  %v1805_v55 = vadd.f32 %v4443_v25, %v4441_v53  ;;  %3116 = vrcp.f32 %v1753_v30 }
 0x3da   : > { %v1861_v11 = vmul.f32 %v3101_v0, %v4236_v23  ;;  %v1860_v58 = vmul.f32 %v3101_v0, %v4234_v46  ;;  %v4451_v57 = vpop.eup %3102 }
 0x3db   : > { %1806 = vadd.xlane.f32.xlu1 %v1805_v55  ;;  %v4453_v59 = vpop.eup %3104 }
 0x3dc   : > { %v1917_v9 = vpack.c.bf16 %v1861_v11, %v1859_v45  ;;  %2232 = vst [vmem:[%s4377_s29 + $0x78] sm:$0xff] %v1861_v11  ;;  %v1916_v8 = vpack.c.bf16 %v1860_v58, %v1858_v27  ;;  %2231 = vst [vmem:[%s4377_s29 + $0x70] sm:$0xff] %v1860_v58  ;;  %v3107_v35 = vpop.eup %3106  ;;  %v1756_v29 = vpop.xlane.xlu0 %1755  ;;  %v1808_v20 = vadd.f32 %v4453_v59, %v4451_v57  ;;  %v4896_v58 = vld [vmem:[#allocation13_spill] sm:$0xff] }
 0x3dd   : > { %3118 = vrcp.f32 %v1756_v29  ;;  %v1863_v46 = vmul.f32 %v3107_v35, %v4248_v32  ;;  %v1862_v23 = vmul.f32 %v3107_v35, %v4246_v39  ;;  %v4897_v29 = vld [vmem:[#allocation14_spill] sm:$0xff] }
 0x3de   : > { %2014 = vmatprep.mubr.bf16.mxu0 %v1917_v9  ;;  %1809 = vadd.xlane.f32.xlu0 %v1808_v20 }
 0x3df   : > { %v4461_v52 = vpop.eup %3108  ;;  %2015 = vmatmul.mubr.bf16.gmra.mxu0 %v1916_v8  ;;  %2234 = vst [vmem:[%s4377_s29 + $0x88] sm:$0xff] %v1863_v46  ;;  %2233 = vst [vmem:[%s4377_s29 + $0x80] sm:$0xff] %v1862_v23 }
 0x3e0   : > { %v4463_v42 = vpop.eup %3110  ;;  %v1759_v26 = vpop.xlane.xlu1 %1758 }
 0x3e1   : > { %v3113_v2 = vpop.eup %3112  ;;  %v1811_v50 = vadd.f32 %v4463_v42, %v4461_v52  ;;  %3120 = vrcp.f32 %v1759_v26  ;;  %v4899_v26 = vld [vmem:[#allocation16_spill] sm:$0xff] }
 0x3e2   : > { %v1865_v39 = vmul.f32 %v3113_v2, %v4258_v15  ;;  %v1864_v32 = vmul.f32 %v3113_v2, %v4256_v13  ;;  %v3115_v34 = vpop.eup %3114 }
 0x3e3   : > { %1812 = vadd.xlane.f32.xlu1 %v1811_v50  ;;  %v1867_v7 = vmul.f32 %v3115_v34, %v4266_v31  ;;  %v1866_v43 = vmul.f32 %v3115_v34, %v4264_v36 }
 0x3e4   : > { %v1919_v16 = vpack.c.bf16 %v1865_v39, %v1863_v46  ;;  %2236 = vst [vmem:[%s4377_s29 + $0x98] sm:$0xff] %v1865_v39  ;;  %v1918_v4 = vpack.c.bf16 %v1864_v32, %v1862_v23  ;;  %2235 = vst [vmem:[%s4377_s29 + $0x90] sm:$0xff] %v1864_v32  ;;  %v1762_v49 = vpop.xlane.xlu0 %1761  ;;  %v4898_v46 = vld [vmem:[#allocation15_spill] sm:$0xff]  ;;  %v4900_v39 = vld [vmem:[#allocation17_spill] sm:$0xff] }
 0x3e5   : > { %3122 = vrcp.f32 %v1762_v49  ;;  %2238 = vst [vmem:[%s4377_s29 + $0xa8] sm:$0xff] %v1867_v7  ;;  %2237 = vst [vmem:[%s4377_s29 + $0xa0] sm:$0xff] %v1866_v43 }
 0x3e6   : > { %2022 = vmatprep.mubr.bf16.mxu0 %v1919_v16  ;;  %v3117_v15 = vpop.eup %3116 }
 0x3e7   : > { %2023 = vmatmul.mubr.bf16.gmra.mxu0 %v1918_v4  ;;  %v1869_v13 = vmul.f32 %v3117_v15, %v4274_v48  ;;  %v1868_v33 = vmul.f32 %v3117_v15, %v4272_v37 }
 0x3e8   : > { %v1765_v6 = vpop.xlane.xlu1 %1764 }
 0x3e9   : > { %3124 = vrcp.f32 %v1765_v6  ;;  %v1921_v41 = vpack.c.bf16 %v1869_v13, %v1867_v7  ;;  %2240 = vst [vmem:[%s4377_s29 + $0xb8] sm:$0xff] %v1869_v13  ;;  %2239 = vst [vmem:[%s4377_s29 + $0xb0] sm:$0xff] %v1868_v33  ;;  %v1920_v36 = vpack.c.bf16 %v1868_v33, %v1866_v43 }
 0x3ea   : > { %v3119_v31 = vpop.eup %3118 }
 0x3eb   : > { %2030 = vmatprep.mubr.bf16.mxu0 %v1921_v41  ;;  %v1871_v21 = vmul.f32 %v3119_v31, %v4282_v60  ;;  %v1870_v38 = vmul.f32 %v3119_v31, %v4280_v51 }
 0x3ec   : > { %v1768_v14 = vpop.xlane.xlu0 %1767 }
 0x3ed   : > { %3126 = vrcp.f32 %v1768_v14  ;;  %2242 = vst [vmem:[%s4377_s29 + $0xc8] sm:$0xff] %v1871_v21  ;;  %2241 = vst [vmem:[%s4377_s29 + $0xc0] sm:$0xff] %v1870_v38 }
 0x3ee   : > { %v3121_v48 = vpop.eup %3120 }
 0x3ef   : > { %2031 = vmatmul.mubr.bf16.gmra.mxu0 %v1920_v36  ;;  %v1873_v37 = vmul.f32 %v3121_v48, %v4290_v3  ;;  %v1872_v45 = vmul.f32 %v3121_v48, %v4288_v18  ;;  %v4901_v36 = vld [vmem:[#allocation19_spill] sm:$0xff] }
 0x3f0   : > { %v1771_v27 = vpop.xlane.xlu1 %1770 }
 0x3f1   : > { %3128 = vrcp.f32 %v1771_v27  ;;  %v1923_v0 = vpack.c.bf16 %v1873_v37, %v1871_v21  ;;  %2244 = vst [vmem:[%s4377_s29 + $0xd8] sm:$0xff] %v1873_v37  ;;  %2243 = vst [vmem:[%s4377_s29 + $0xd0] sm:$0xff] %v1872_v45  ;;  %v1922_v51 = vpack.c.bf16 %v1872_v45, %v1870_v38  ;;  %v4902_v38 = vld [vmem:[#allocation18_spill] sm:$0xff]  ;;  %v4904_v37 = vld [vmem:[#allocation20_spill] sm:$0xff] }
 0x3f2   : > { %v3123_v60 = vpop.eup %3122 }
 0x3f3   : > { %2038 = vmatprep.mubr.bf16.mxu0 %v1923_v0  ;;  %v1875_v30 = vmul.f32 %v3123_v60, %v4298_v61  ;;  %v1874_v55 = vmul.f32 %v3123_v60, %v4296_v1 }
 0x3f4   : > { %v1774_v11 = vpop.xlane.xlu0 %1773 }
 0x3f5   : > { %3130 = vrcp.f32 %v1774_v11  ;;  %2246 = vst [vmem:[%s4377_s29 + $0xe8] sm:$0xff] %v1875_v30  ;;  %2245 = vst [vmem:[%s4377_s29 + $0xe0] sm:$0xff] %v1874_v55 }
 0x3f6   : > { %v3125_v3 = vpop.eup %3124 }
 0x3f7   : > { %2039 = vmatmul.mubr.bf16.gmra.mxu0 %v1922_v51  ;;  %v1877_v18 = vmul.f32 %v3125_v3, %v4306_v28  ;;  %v1876_v9 = vmul.f32 %v3125_v3, %v4896_v58  ;;  %v4905_v51 = vld [vmem:[#allocation23_spill] sm:$0xff] }
 0x3f8   : > { %v1777_v8 = vpop.xlane.xlu1 %1776 }
 0x3f9   : > { %3132 = vrcp.f32 %v1777_v8  ;;  %v1925_v35 = vpack.c.bf16 %v1877_v18, %v1875_v30  ;;  %2248 = vst [vmem:[%s4377_s29 + $0xf8] sm:$0xff] %v1877_v18  ;;  %2247 = vst [vmem:[%s4377_s29 + $0xf0] sm:$0xff] %v1876_v9  ;;  %v1924_v1 = vpack.c.bf16 %v1876_v9, %v1874_v55  ;;  %v4906_v55 = vld [vmem:[#allocation22_spill] sm:$0xff]  ;;  %v4907_v18 = vld [vmem:[#allocation25_spill] sm:$0xff] }
 0x3fa   : > { %v3127_v61 = vpop.eup %3126  ;;  %v4908_v9 = vld [vmem:[#allocation24_spill] sm:$0xff] }
 0x3fb   : > { %2046 = vmatprep.mubr.bf16.mxu0 %v1925_v35  ;;  %v1879_v20 = vmul.f32 %v3127_v61, %v4897_v29  ;;  %v1878_v23 = vmul.f32 %v3127_v61, %v4898_v46 }
 0x3fc   : > { %v1780_v2 = vpop.xlane.xlu0 %1779 }
 0x3fd   : > { %3134 = vrcp.f32 %v1780_v2  ;;  %2250 = vst [vmem:[%s4377_s29 + $0x108] sm:$0xff] %v1879_v20  ;;  %2249 = vst [vmem:[%s4377_s29 + $0x100] sm:$0xff] %v1878_v23 }
 0x3fe   : > { %v3129_v28 = vpop.eup %3128 }
 0x3ff   : > { %2047 = vmatmul.mubr.bf16.gmra.mxu0 %v1924_v1  ;;  %v1881_v50 = vmul.f32 %v3129_v28, %v4899_v26  ;;  %v1880_v32 = vmul.f32 %v3129_v28, %v4900_v39 }
 0x400   : > { %v1783_v34 = vpop.xlane.xlu1 %1782 }
 0x401   : > { %3136 = vrcp.f32 %v1783_v34  ;;  %v1927_v16 = vpack.c.bf16 %v1881_v50, %v1879_v20  ;;  %2252 = vst [vmem:[%s4377_s29 + $0x118] sm:$0xff] %v1881_v50  ;;  %2251 = vst [vmem:[%s4377_s29 + $0x110] sm:$0xff] %v1880_v32  ;;  %v1926_v7 = vpack.c.bf16 %v1880_v32, %v1878_v23 }
 0x402   : > { %v3131_v4 = vpop.eup %3130 }
 0x403   : > { %2054 = vmatprep.mubr.bf16.mxu0 %v1927_v16  ;;  %v1883_v43 = vmul.f32 %v3131_v4, %v4330_v56  ;;  %v1882_v49 = vmul.f32 %v3131_v4, %v4328_v44 }
 0x404   : > { %v1786_v15 = vpop.xlane.xlu0 %1785 }
 0x405   : > { %3138 = vrcp.f32 %v1786_v15  ;;  %2254 = vst [vmem:[%s4377_s29 + $0x128] sm:$0xff] %v1883_v43  ;;  %2253 = vst [vmem:[%s4377_s29 + $0x120] sm:$0xff] %v1882_v49 }
 0x406   : > { %v3133_v13 = vpop.eup %3132 }
 0x407   : > { %2055 = vmatmul.mubr.bf16.gmra.mxu0 %v1926_v7  ;;  %v1885_v33 = vmul.f32 %v3133_v13, %v4338_v10  ;;  %v1884_v6 = vmul.f32 %v3133_v13, %v4336_v63  ;;  %v4903_v63 = vld [vmem:[#allocation21_spill] sm:$0xff] }
 0x408   : > { %v1789_v41 = vpop.xlane.xlu1 %1788 }
 0x409   : > { %3140 = vrcp.f32 %v1789_v41  ;;  %v1929_v31 = vpack.c.bf16 %v1885_v33, %v1883_v43  ;;  %2256 = vst [vmem:[%s4377_s29 + $0x138] sm:$0xff] %v1885_v33  ;;  %2255 = vst [vmem:[%s4377_s29 + $0x130] sm:$0xff] %v1884_v6  ;;  %v1928_v56 = vpack.c.bf16 %v1884_v6, %v1882_v49 }
 0x40a   : > { %v3135_v44 = vpop.eup %3134 }
 0x40b   : > { %2062 = vmatprep.mubr.bf16.mxu0 %v1929_v31  ;;  %v1887_v21 = vmul.f32 %v3135_v44, %v4901_v36  ;;  %v1886_v14 = vmul.f32 %v3135_v44, %v4902_v38 }
 0x40d   : > { %2258 = vst [vmem:[%s4377_s29 + $0x148] sm:$0xff] %v1887_v21  ;;  %2257 = vst [vmem:[%s4377_s29 + $0x140] sm:$0xff] %v1886_v14 }
 0x40e   : > { %v3137_v10 = vpop.eup %3136 }
 0x40f   : > { %2063 = vmatmul.mubr.bf16.gmra.mxu0 %v1928_v56  ;;  %v1889_v48 = vmul.f32 %v3137_v10, %v4903_v63  ;;  %v1888_v45 = vmul.f32 %v3137_v10, %v4904_v37 }
 0x411   : > { %v1931_v27 = vpack.c.bf16 %v1889_v48, %v1887_v21  ;;  %2260 = vst [vmem:[%s4377_s29 + $0x158] sm:$0xff] %v1889_v48  ;;  %2259 = vst [vmem:[%s4377_s29 + $0x150] sm:$0xff] %v1888_v45  ;;  %v1930_v60 = vpack.c.bf16 %v1888_v45, %v1886_v14  ;;  %v4561_v14 = vstv %s2119_s10 }
 0x412   : > { %v3139_v0 = vpop.eup %3138 }
 0x413   : > { %2070 = vmatprep.mubr.bf16.mxu0 %v1931_v27  ;;  %v1891_v30 = vmul.f32 %v3139_v0, %v4905_v51  ;;  %v1890_v11 = vmul.f32 %v3139_v0, %v4906_v55 }
 0x415   : > { %2262 = vst [vmem:[%s4377_s29 + $0x168] sm:$0xff] %v1891_v30  ;;  %2261 = vst [vmem:[%s4377_s29 + $0x160] sm:$0xff] %v1890_v11 }
 0x416   : > { %v3141_v3 = vpop.eup %3140 }
 0x417   : > { %2071 = vmatmul.mubr.bf16.gmra.mxu0 %v1930_v60  ;;  %v1893_v58 = vmul.f32 %v3141_v3, %v4907_v18  ;;  %v1892_v8 = vmul.f32 %v3141_v3, %v4908_v9  ;;  %v3159_v60 = vld [vmem:[%s3479_s28 + $0x8] sm:$0xff] }
 0x419   : > { %v1933_v35 = vpack.c.bf16 %v1893_v58, %v1891_v30  ;;  %2264 = vst [vmem:[%s4377_s29 + $0x178] sm:$0xff] %v1893_v58  ;;  %2263 = vst [vmem:[%s4377_s29 + $0x170] sm:$0xff] %v1892_v8  ;;  %v1932_v61 = vpack.c.bf16 %v1892_v8, %v1890_v11  ;;  %v3160_v58 = vld [vmem:[%s3479_s28 + $0x10] sm:$0xff] }
 0x41b   : > { %2078 = vmatprep.mubr.bf16.mxu0 %v1933_v35 }
 0x41f   : > { %2079 = vmatmul.mubr.bf16.gmra.mxu0 %v1932_v61 }
 0x44f   : > { %v1792_v1 = vpop.xlane.xlu0 %1791 }
 0x450   : > { %3142 = vrcp.f32 %v1792_v1 }
 0x453   : > { %v1795_v29 = vpop.xlane.xlu1 %1794 }
 0x454   : > { %3144 = vrcp.f32 %v1795_v29  ;;  %v3161_v29 = vld [vmem:[%s3479_s28 + $0x18] sm:$0xff] }
 0x457   : > { %v1798_v20 = vpop.xlane.xlu0 %1797 }
 0x458   : > { %3146 = vrcp.f32 %v1798_v20 }
 0x45b   : > { %v1801_v46 = vpop.xlane.xlu1 %1800 }
 0x45c   : > { %3148 = vrcp.f32 %v1801_v46 }
 0x45d   : > { %v3143_v23 = vpop.eup %3142 }
 0x45e   : > { %v1895_v2 = vmul.f32 %v3143_v23, %v4389_v62  ;;  %v1894_v28 = vmul.f32 %v3143_v23, %v4386_v12 }
 0x45f   : > { %v1804_v26 = vpop.xlane.xlu0 %1803 }
 0x460   : > { %3150 = vrcp.f32 %v1804_v26  ;;  %2266 = vst [vmem:[%s4377_s29 + $0x188] sm:$0xff] %v1895_v2  ;;  %2265 = vst [vmem:[%s4377_s29 + $0x180] sm:$0xff] %v1894_v28  ;;  %v3162_v26 = vld [vmem:[%s3479_s28 + $0x20] sm:$0xff] }
 0x461   : > { %v3145_v50 = vpop.eup %3144 }
 0x462   : > { %v1897_v39 = vmul.f32 %v3145_v50, %v4399_v17  ;;  %v1896_v32 = vmul.f32 %v3145_v50, %v4396_v47 }
 0x464   : > { %v1807_v34 = vpop.xlane.xlu1 %1806  ;;  %v1935_v16 = vpack.c.bf16 %v1897_v39, %v1895_v2  ;;  %2268 = vst [vmem:[%s4377_s29 + $0x198] sm:$0xff] %v1897_v39  ;;  %v1934_v4 = vpack.c.bf16 %v1896_v32, %v1894_v28  ;;  %2267 = vst [vmem:[%s4377_s29 + $0x190] sm:$0xff] %v1896_v32 }
 0x465   : > { %3152 = vrcp.f32 %v1807_v34  ;;  %v3147_v62 = vpop.eup %3146 }
 0x466   : > { %2086 = vmatprep.mubr.bf16.mxu0 %v1935_v16  ;;  %v1899_v12 = vmul.f32 %v3147_v62, %v4411_v54  ;;  %v1898_v7 = vmul.f32 %v3147_v62, %v4408_v22 }
 0x467   : > { %v1810_v43 = vpop.xlane.xlu0 %1809  ;;  %2087 = vmatmul.mubr.bf16.gmra.mxu0 %v1934_v4  ;;  %v3163_v4 = vld [vmem:[%s3479_s28 + $0x28] sm:$0xff] }
 0x468   : > { %3154 = vrcp.f32 %v1810_v43  ;;  %2270 = vst [vmem:[%s4377_s29 + $0x1a8] sm:$0xff] %v1899_v12  ;;  %2269 = vst [vmem:[%s4377_s29 + $0x1a0] sm:$0xff] %v1898_v7 }
 0x469   : > { %v3149_v47 = vpop.eup %3148 }
 0x46a   : > { %v1901_v17 = vmul.f32 %v3149_v47, %v4423_v19  ;;  %v1900_v49 = vmul.f32 %v3149_v47, %v4420_v5 }
 0x46c   : > { %v1813_v15 = vpop.xlane.xlu1 %1812  ;;  %v1937_v13 = vpack.c.bf16 %v1901_v17, %v1899_v12  ;;  %2272 = vst [vmem:[%s4377_s29 + $0x1b8] sm:$0xff] %v1901_v17  ;;  %v1936_v54 = vpack.c.bf16 %v1900_v49, %v1898_v7  ;;  %2271 = vst [vmem:[%s4377_s29 + $0x1b0] sm:$0xff] %v1900_v49  ;;  %v3164_v17 = vld [vmem:[%s3479_s28 + $0x30] sm:$0xff] }
 0x46d   : > { %3156 = vrcp.f32 %v1813_v15  ;;  %v3151_v22 = vpop.eup %3150 }
 0x46e   : > { %2094 = vmatprep.mubr.bf16.mxu0 %v1937_v13  ;;  %v1903_v33 = vmul.f32 %v3151_v22, %v4433_v24  ;;  %v1902_v6 = vmul.f32 %v3151_v22, %v4431_v40 }
 0x46f   : > { %2095 = vmatmul.mubr.bf16.gmra.mxu0 %v1936_v54 }
 0x470   : > { %2274 = vst [vmem:[%s4377_s29 + $0x1c8] sm:$0xff] %v1903_v33  ;;  %2273 = vst [vmem:[%s4377_s29 + $0x1c0] sm:$0xff] %v1902_v6 }
 0x472   : > { %v3153_v5 = vpop.eup %3152 }
 0x473   : > { %v1905_v19 = vmul.f32 %v3153_v5, %v4443_v25  ;;  %v1904_v41 = vmul.f32 %v3153_v5, %v4441_v53 }
 0x475   : > { %v1939_v31 = vpack.c.bf16 %v1905_v19, %v1903_v33  ;;  %2276 = vst [vmem:[%s4377_s29 + $0x1d8] sm:$0xff] %v1905_v19  ;;  %v1938_v44 = vpack.c.bf16 %v1904_v41, %v1902_v6  ;;  %2275 = vst [vmem:[%s4377_s29 + $0x1d0] sm:$0xff] %v1904_v41  ;;  %v3155_v56 = vpop.eup %3154  ;;  %v3165_v33 = vld [vmem:[%s3479_s28 + $0x38] sm:$0xff] }
 0x476   : > { %v1907_v40 = vmul.f32 %v3155_v56, %v4453_v59  ;;  %v1906_v24 = vmul.f32 %v3155_v56, %v4451_v57 }
 0x477   : > { %2102 = vmatprep.mubr.bf16.mxu0 %v1939_v31 }
 0x478   : > { %2103 = vmatmul.mubr.bf16.gmra.mxu0 %v1938_v44  ;;  %2278 = vst [vmem:[%s4377_s29 + $0x1e8] sm:$0xff] %v1907_v40  ;;  %2277 = vst [vmem:[%s4377_s29 + $0x1e0] sm:$0xff] %v1906_v24  ;;  %v3166_v44 = vld [vmem:[%s3479_s28 + $0x40] sm:$0xff] }
 0x47a   : > { %v3157_v36 = vpop.eup %3156 }
 0x47b   : > { %v1909_v25 = vmul.f32 %v3157_v36, %v4463_v42  ;;  %v1908_v53 = vmul.f32 %v3157_v36, %v4461_v52  ;;  %v3158_v52 = vld [vmem:[%s3479_s28] sm:$0xff] }
 0x47d   : > { %v1941_v21 = vpack.c.bf16 %v1909_v25, %v1907_v40  ;;  %2280 = vst [vmem:[%s4377_s29 + $0x1f8] sm:$0xff] %v1909_v25  ;;  %v1940_v38 = vpack.c.bf16 %v1908_v53, %v1906_v24  ;;  %2279 = vst [vmem:[%s4377_s29 + $0x1f0] sm:$0xff] %v1908_v53  ;;  %v3167_v53 = vld [vmem:[%s3479_s28 + $0x48] sm:$0xff]  ;;  %s3224_s29 = scalar_lea.vmem %s3223_s20, 16384 }
 0x47e   : > { %p3226_p7 = scmp.lt.s32.totalorder %s3224_s29, %s3218_s18 }
 0x47f   : > { %2110 = vmatprep.mubr.bf16.mxu0 %v1941_v21 }
 0x480   : > { %2111 = vmatmul.mubr.bf16.gmra.mxu0 %v1940_v38  ;;  %p3227_p8 = por %p3226_p7, %p3225_p5 }
 0x482   : > { %p3228_p10 = pnand %p3227_p8, %p3221_p4 }
 0x484   : > { %v2621_v59 = vpop.f32.mrf.mxu0 }
 0x486   : > { %v2622_v57 = vpop.f32.mrf.mxu0 }
 0x487   : > { %v2623_v10 = vadd.f32 %v2622_v57, %v2621_v59 }
 0x488   : > { %v2624_v63 = vpop.f32.mrf.mxu0 }
 0x489   : > { %v2121_v42 = vmul.f32 %v2623_v10, %v4561_v14 }
 0x48a   : > { %v2625_v48 = vpop.f32.mrf.mxu0 }
 0x48b   : > { %v2153_v37 = vadd.f32 %v3158_v52, %v2121_v42  ;;  %v2626_v45 = vadd.f32 %v2625_v48, %v2624_v63  ;;  %v3168_v63 = vld [vmem:[%s3479_s28 + $0x50] sm:$0xff] }
 0x48d   : > { %2185 = vst [vmem:[%s4567_s15] sm:$0xff] %v2153_v37  ;;  %v2122_v27 = vmul.f32 %v2626_v45, %v4561_v14 }
 0x48e   : > { %v2627_v0 = vpop.f32.mrf.mxu0 }
 0x48f   : > { %v2154_v51 = vadd.f32 %v3159_v60, %v2122_v27  ;;  %v3169_v27 = vld [vmem:[%s3479_s28 + $0x58] sm:$0xff] }
 0x490   : > { %v2628_v30 = vpop.f32.mrf.mxu0 }
 0x491   : > { %2186 = vst [vmem:[%s4567_s15 + $0x8] sm:$0xff] %v2154_v51  ;;  %v2629_v55 = vadd.f32 %v2628_v30, %v2627_v0 }
 0x492   : > { %v2630_v11 = vpop.f32.mrf.mxu0 }
 0x493   : > { %v2123_v3 = vmul.f32 %v2629_v55, %v4561_v14 }
 0x494   : > { %v2631_v18 = vpop.f32.mrf.mxu0 }
 0x495   : > { %v2155_v9 = vadd.f32 %v3160_v58, %v2123_v3  ;;  %v2632_v8 = vadd.f32 %v2631_v18, %v2630_v11  ;;  %v3170_v11 = vld [vmem:[%s3479_s28 + $0x60] sm:$0xff] }
 0x496   : > { %v2633_v35 = vpop.f32.mrf.mxu0 }
 0x497   : > { %2187 = vst [vmem:[%s4567_s15 + $0x10] sm:$0xff] %v2155_v9  ;;  %v2124_v61 = vmul.f32 %v2632_v8, %v4561_v14 }
 0x498   : > { %v2634_v1 = vpop.f32.mrf.mxu0 }
 0x499   : > { %v2156_v20 = vadd.f32 %v3161_v29, %v2124_v61  ;;  %v2635_v46 = vadd.f32 %v2634_v1, %v2633_v35  ;;  %v3171_v35 = vld [vmem:[%s3479_s28 + $0x68] sm:$0xff] }
 0x49a   : > { %v2636_v23 = vpop.f32.mrf.mxu0 }
 0x49b   : > { %2188 = vst [vmem:[%s4567_s15 + $0x18] sm:$0xff] %v2156_v20  ;;  %v2125_v2 = vmul.f32 %v2635_v46, %v4561_v14 }
 0x49c   : > { %v2637_v28 = vpop.f32.mrf.mxu0 }
 0x49d   : > { %v2157_v50 = vadd.f32 %v3162_v26, %v2125_v2  ;;  %v2638_v39 = vadd.f32 %v2637_v28, %v2636_v23  ;;  %v3172_v23 = vld [vmem:[%s3479_s28 + $0x70] sm:$0xff] }
 0x49f   : > { %v2639_v32 = vpop.f32.mrf.mxu0  ;;  %2189 = vst [vmem:[%s4567_s15 + $0x20] sm:$0xff] %v2157_v50  ;;  %v2126_v34 = vmul.f32 %v2638_v39, %v4561_v14 }
 0x4a1   : > { %v2640_v16 = vpop.f32.mrf.mxu0  ;;  %v2158_v62 = vadd.f32 %v3163_v4, %v2126_v34 }
 0x4a2   : > { %v2641_v12 = vadd.f32 %v2640_v16, %v2639_v32  ;;  %v3173_v32 = vld [vmem:[%s3479_s28 + $0x78] sm:$0xff] }
 0x4a3   : > { %v2642_v7 = vpop.f32.mrf.mxu0  ;;  %2190 = vst [vmem:[%s4567_s15 + $0x28] sm:$0xff] %v2158_v62 }
 0x4a4   : > { %v2127_v43 = vmul.f32 %v2641_v12, %v4561_v14 }
 0x4a5   : > { %v2643_v47 = vpop.f32.mrf.mxu0 }
 0x4a6   : > { %v2159_v49 = vadd.f32 %v3164_v17, %v2127_v43  ;;  %v2644_v15 = vadd.f32 %v2643_v47, %v2642_v7  ;;  %v3174_v7 = vld [vmem:[%s3479_s28 + $0x80] sm:$0xff] }
 0x4a7   : > { %v2645_v13 = vpop.f32.mrf.mxu0 }
 0x4a8   : > { %2191 = vst [vmem:[%s4567_s15 + $0x30] sm:$0xff] %v2159_v49  ;;  %v2128_v54 = vmul.f32 %v2644_v15, %v4561_v14 }
 0x4a9   : > { %v2646_v22 = vpop.f32.mrf.mxu0 }
 0x4aa   : > { %v2160_v6 = vadd.f32 %v3165_v33, %v2128_v54  ;;  %v2647_v5 = vadd.f32 %v2646_v22, %v2645_v13  ;;  %v3175_v13 = vld [vmem:[%s3479_s28 + $0x88] sm:$0xff] }
 0x4ab   : > { %v2648_v19 = vpop.f32.mrf.mxu0 }
 0x4ac   : > { %2192 = vst [vmem:[%s4567_s15 + $0x38] sm:$0xff] %v2160_v6  ;;  %v2129_v41 = vmul.f32 %v2647_v5, %v4561_v14 }
 0x4ad   : > { %v2649_v31 = vpop.f32.mrf.mxu0 }
 0x4ae   : > { %v2161_v56 = vadd.f32 %v3166_v44, %v2129_v41  ;;  %v2650_v40 = vadd.f32 %v2649_v31, %v2648_v19 }
 0x4af   : > { %v2651_v24 = vpop.f32.mrf.mxu0 }
 0x4b0   : > { %2193 = vst [vmem:[%s4567_s15 + $0x40] sm:$0xff] %v2161_v56  ;;  %v2130_v36 = vmul.f32 %v2650_v40, %v4561_v14 }
 0x4b1   : > { %v2652_v25 = vpop.f32.mrf.mxu0 }
 0x4b2   : > { %v2162_v21 = vadd.f32 %v3167_v53, %v2130_v36  ;;  %v2653_v38 = vadd.f32 %v2652_v25, %v2651_v24 }
 0x4b3   : > { %v2654_v59 = vpop.f32.mrf.mxu0 }
 0x4b4   : > { %2194 = vst [vmem:[%s4567_s15 + $0x48] sm:$0xff] %v2162_v21  ;;  %v2131_v57 = vmul.f32 %v2653_v38, %v4561_v14 }
 0x4b5   : > { %v2655_v10 = vpop.f32.mrf.mxu0 }
 0x4b6   : > { %v2163_v42 = vadd.f32 %v3168_v63, %v2131_v57  ;;  %v2656_v48 = vadd.f32 %v2655_v10, %v2654_v59 }
 0x4b7   : > { %v2657_v52 = vpop.f32.mrf.mxu0 }
 0x4b8   : > { %2195 = vst [vmem:[%s4567_s15 + $0x50] sm:$0xff] %v2163_v42  ;;  %v2132_v37 = vmul.f32 %v2656_v48, %v4561_v14 }
 0x4b9   : > { %v2658_v45 = vpop.f32.mrf.mxu0 }
 0x4ba   : > { %v2164_v0 = vadd.f32 %v3169_v27, %v2132_v37  ;;  %v2659_v60 = vadd.f32 %v2658_v45, %v2657_v52 }
 0x4bb   : > { %v2660_v51 = vpop.f32.mrf.mxu0 }
 0x4bc   : > { %2196 = vst [vmem:[%s4567_s15 + $0x58] sm:$0xff] %v2164_v0  ;;  %v2133_v30 = vmul.f32 %v2659_v60, %v4561_v14 }
 0x4bd   : > { %v2661_v55 = vpop.f32.mrf.mxu0 }
 0x4be   : > { %v2165_v3 = vadd.f32 %v3170_v11, %v2133_v30  ;;  %v2662_v18 = vadd.f32 %v2661_v55, %v2660_v51 }
 0x4bf   : > { %v2663_v58 = vpop.f32.mrf.mxu0 }
 0x4c0   : > { %2197 = vst [vmem:[%s4567_s15 + $0x60] sm:$0xff] %v2165_v3  ;;  %v2134_v9 = vmul.f32 %v2662_v18, %v4561_v14 }
 0x4c1   : > { %v2664_v8 = vpop.f32.mrf.mxu0 }
 0x4c2   : > { %v2166_v61 = vadd.f32 %v3171_v35, %v2134_v9  ;;  %v2665_v1 = vadd.f32 %v2664_v8, %v2663_v58 }
 0x4c3   : > { %v2666_v29 = vpop.f32.mrf.mxu0 }
 0x4c4   : > { %2198 = vst [vmem:[%s4567_s15 + $0x68] sm:$0xff] %v2166_v61  ;;  %v2135_v20 = vmul.f32 %v2665_v1, %v4561_v14 }
 0x4c5   : > { %v2667_v46 = vpop.f32.mrf.mxu0 }
 0x4c6   : > { %v2167_v2 = vadd.f32 %v3172_v23, %v2135_v20  ;;  %v2668_v28 = vadd.f32 %v2667_v46, %v2666_v29 }
 0x4c7   : > { %v2669_v26 = vpop.f32.mrf.mxu0 }
 0x4c8   : > { %2199 = vst [vmem:[%s4567_s15 + $0x70] sm:$0xff] %v2167_v2  ;;  %v2136_v50 = vmul.f32 %v2668_v28, %v4561_v14 }
 0x4c9   : > { %v2670_v39 = vpop.f32.mrf.mxu0 }
 0x4ca   : > { %v2168_v34 = vadd.f32 %v3173_v32, %v2136_v50  ;;  %v2671_v16 = vadd.f32 %v2670_v39, %v2669_v26 }
 0x4cb   : > { %v2672_v4 = vpop.f32.mrf.mxu0 }
 0x4cc   : > { %2200 = vst [vmem:[%s4567_s15 + $0x78] sm:$0xff] %v2168_v34  ;;  %v2137_v62 = vmul.f32 %v2671_v16, %v4561_v14 }
 0x4cd   : > { %v2673_v12 = vpop.f32.mrf.mxu0 }
 0x4ce   : > { %v2169_v43 = vadd.f32 %v3174_v7, %v2137_v62  ;;  %v2674_v47 = vadd.f32 %v2673_v12, %v2672_v4 }
 0x4cf   : > { %v2675_v17 = vpop.f32.mrf.mxu0 }
 0x4d0   : > { %2201 = vst [vmem:[%s4567_s15 + $0x80] sm:$0xff] %v2169_v43  ;;  %v2138_v49 = vmul.f32 %v2674_v47, %v4561_v14 }
 0x4d1   : > { %v2676_v15 = vpop.f32.mrf.mxu0 }
 0x4d2   : > { %v2170_v54 = vadd.f32 %v3175_v13, %v2138_v49  ;;  %v2677_v22 = vadd.f32 %v2676_v15, %v2675_v17 }
 0x4d3   : > { %v2678_v33 = vpop.f32.mrf.mxu0 }
 0x4d4   : > { %2202 = vst [vmem:[%s4567_s15 + $0x88] sm:$0xff] %v2170_v54  ;;  %v2139_v6 = vmul.f32 %v2677_v22, %v4561_v14 }
 0x4d5   : > { %3231 = shalt.err (!%p3228_p10)
}
 0x4d6   : > { %s3232_s10 = scalar_lea.hbm %s4625_s21, 8192  ;;  %s3236_s30 = scalar_lea.hbm %s4754_s9, 16384 }
 0x4d7   : > { %p3233_p0 = scmp.ne.s32.totalorder %s4625_s21, %s3232_s10  ;;  %p3237_p1 = scmp.lt.s32.totalorder %s4625_s21, %s4754_s9 }
 0x4d8   : > { %p3238_p3 = scmp.lt.s32.totalorder %s3236_s30, %s3232_s10 }
 0x4d9   : > { %p3234_p2 = pnand %p3233_p0, %p4909_p12 }
 0x4da   : > { %p3239_p6 = por %p3238_p3, %p3237_p1 }
 0x4db   : > { %p3235_p9 = pneg %p3234_p2 }
 0x4dd   : > { %p3240_p11 = pnand %p3239_p6, %p3235_p9 }
 0x4df   : > { %3243 = shalt.err (!%p3240_p11)
}
 0x4e0   : > { %s3318_s18 = smov 256   ;;  %s3319_s20 = smov 16   ;;  %v2679_v5 = vpop.f32.mrf.mxu0  ;;  %v3176_v19 = vld [vmem:[%s3479_s28 + $0x90] sm:$0xff]  ;;  %v3177_v24 = vld [vmem:[%s3479_s28 + $0x98] sm:$0xff]  ;;  %v3178_v59 = vld [vmem:[%s3479_s28 + $0xa0] sm:$0xff] }
 0x4e1   : > { %s4910_s29 = scalar_lea.sflag [#allocation8], %s3473_s19  ;;  %v2171_v41 = vadd.f32 %v3176_v19, %v2139_v6  ;;  %v2680_v31 = vadd.f32 %v2679_v5, %v2678_v33  ;;  %v3179_v52 = vld [vmem:[%s3479_s28 + $0xa8] sm:$0xff]  ;;  %v3180_v51 = vld [vmem:[%s3479_s28 + $0xb0] sm:$0xff]  ;;  %v3181_v3 = vld [vmem:[%s3479_s28 + $0xb8] sm:$0xff]  ;;  %s2282_s24 = scalar_lea.sflag [#allocation5], %s3473_s19 }
 0x4e2   : > { %2888 = dma.vmem_to_hbm [thread:$0]  (%p4909_p12), %s4627_s17, 8192, %s4625_s21, %s4910_s29, %s3318_s18, %s3318_s18, %s3319_s20   ;;  %v2681_v44 = vpop.f32.mrf.mxu0 }
 0x4e3   : > { %2203 = vst [vmem:[%s4567_s15 + $0x90] sm:$0xff] %v2171_v41  ;;  %v2140_v56 = vmul.f32 %v2680_v31, %v4561_v14  ;;  %v3182_v29 = vld [vmem:[%s3479_s28 + $0xc0] sm:$0xff]  ;;  %v3183_v26 = vld [vmem:[%s3479_s28 + $0xc8] sm:$0xff]  ;;  %v3184_v4 = vld [vmem:[%s3479_s28 + $0xd0] sm:$0xff]  ;;  %s2483_s17 = sshll.u32 %s3397_s7, 12  ;;  %s2300_s21 = sshll.u32 %s4567_s15, 4  ;;  %s4700_s21 = int_to_ptr.vmem [resolvable:$true] %s2300_s21 }
 0x4e4   : > { %v2682_v40 = vpop.f32.mrf.mxu0  ;;  %v3185_v17 = vld [vmem:[%s3479_s28 + $0xd8] sm:$0xff]  ;;  %v3186_v33 = vld [vmem:[%s3479_s28 + $0xe0] sm:$0xff]  ;;  %s4698_s26 = scalar_lea.hbm %s4753_s8, %s2483_s17  ;;  %s3244_s30 = scalar_lea.vmem %s4700_s21, 4096 }
 0x4e5   : > { %v2172_v36 = vadd.f32 %v3177_v24, %v2140_v56  ;;  %v2683_v25 = vadd.f32 %v2682_v40, %v2681_v44  ;;  %v3187_v44 = vld [vmem:[%s3479_s28 + $0xe8] sm:$0xff]  ;;  %p3245_p13 = scmp.ne.s32.totalorder %s4700_s21, %s3244_s30  ;;  %s3320_s7 = smov [#allocation6]  }
 0x4e6   : > { %v2684_v53 = vpop.f32.mrf.mxu0  ;;  %s3248_s27 = sshll.u32 %s3320_s7, 4  ;;  %s3249_s27 = int_to_ptr.vmem [resolvable:$false] %s3248_s27 }
 0x4e7   : > { %2204 = vst [vmem:[%s4567_s15 + $0x98] sm:$0xff] %v2172_v36  ;;  %v2141_v21 = vmul.f32 %v2683_v25, %v4561_v14  ;;  %p3246_p4 = pnand %p3245_p13, %p4909_p12  ;;  %s3250_s18 = scalar_lea.vmem %s3249_s27, 8192 }
 0x4e8   : > { %v2685_v38 = vpop.f32.mrf.mxu0  ;;  %p3251_p7 = scmp.lt.s32.totalorder %s4700_s21, %s3249_s27  ;;  %p3252_p8 = scmp.lt.s32.totalorder %s3250_s18, %s3244_s30 }
 0x4e9   : > { %v2173_v57 = vadd.f32 %v3178_v59, %v2141_v21  ;;  %v2686_v10 = vadd.f32 %v2685_v38, %v2684_v53  ;;  %v3188_v53 = vld [vmem:[%s3479_s28 + $0xf0] sm:$0xff]  ;;  %p3247_p5 = pneg %p3246_p4 }
 0x4ea   : > { %v2687_v63 = vpop.f32.mrf.mxu0  ;;  %p3253_p10 = por %p3252_p8, %p3251_p7 }
 0x4eb   : > { %2205 = vst [vmem:[%s4567_s15 + $0xa0] sm:$0xff] %v2173_v57  ;;  %v2142_v42 = vmul.f32 %v2686_v10, %v4561_v14  ;;  %v3189_v57 = vld [vmem:[%s3479_s28 + $0xf8] sm:$0xff] }
 0x4ec   : > { %v2688_v48 = vpop.f32.mrf.mxu0  ;;  %p3254_p0 = pnand %p3253_p10, %p3247_p5 }
 0x4ed   : > { %v2174_v37 = vadd.f32 %v3179_v52, %v2142_v42  ;;  %v2689_v45 = vadd.f32 %v2688_v48, %v2687_v63 }
 0x4ee   : > { %v2690_v27 = vpop.f32.mrf.mxu0 }
 0x4ef   : > { %2206 = vst [vmem:[%s4567_s15 + $0xa8] sm:$0xff] %v2174_v37  ;;  %v2143_v0 = vmul.f32 %v2689_v45, %v4561_v14 }
 0x4f0   : > { %v2691_v60 = vpop.f32.mrf.mxu0 }
 0x4f1   : > { %v2175_v30 = vadd.f32 %v3180_v51, %v2143_v0  ;;  %v2692_v55 = vadd.f32 %v2691_v60, %v2690_v27 }
 0x4f3   : > { %2207 = vst [vmem:[%s4567_s15 + $0xb0] sm:$0xff] %v2175_v30  ;;  %v2144_v11 = vmul.f32 %v2692_v55, %v4561_v14 }
 0x4f5   : > { %v2176_v18 = vadd.f32 %v3181_v3, %v2144_v11 }
 0x4f7   : > { %2208 = vst [vmem:[%s4567_s15 + $0xb8] sm:$0xff] %v2176_v18 }
 0x527   : > { %v2693_v58 = vpop.f32.mrf.mxu0 }
 0x529   : > { %v2694_v9 = vpop.f32.mrf.mxu0 }
 0x52a   : > { %v2695_v8 = vadd.f32 %v2694_v9, %v2693_v58 }
 0x52b   : > { %v2696_v35 = vpop.f32.mrf.mxu0 }
 0x52c   : > { %v2145_v61 = vmul.f32 %v2695_v8, %v4561_v14 }
 0x52d   : > { %v2697_v1 = vpop.f32.mrf.mxu0 }
 0x52e   : > { %v2177_v20 = vadd.f32 %v3182_v29, %v2145_v61  ;;  %v2698_v46 = vadd.f32 %v2697_v1, %v2696_v35 }
 0x52f   : > { %v2699_v23 = vpop.f32.mrf.mxu0 }
 0x530   : > { %2209 = vst [vmem:[%s4567_s15 + $0xc0] sm:$0xff] %v2177_v20  ;;  %v2146_v2 = vmul.f32 %v2698_v46, %v4561_v14 }
 0x531   : > { %v2700_v28 = vpop.f32.mrf.mxu0 }
 0x532   : > { %v2178_v50 = vadd.f32 %v3183_v26, %v2146_v2  ;;  %v2701_v39 = vadd.f32 %v2700_v28, %v2699_v23 }
 0x533   : > { %v2702_v32 = vpop.f32.mrf.mxu0 }
 0x534   : > { %2210 = vst [vmem:[%s4567_s15 + $0xc8] sm:$0xff] %v2178_v50  ;;  %v2147_v34 = vmul.f32 %v2701_v39, %v4561_v14 }
 0x535   : > { %v2703_v16 = vpop.f32.mrf.mxu0 }
 0x536   : > { %v2179_v62 = vadd.f32 %v3184_v4, %v2147_v34  ;;  %v2704_v12 = vadd.f32 %v2703_v16, %v2702_v32 }
 0x538   : > { %v2705_v7 = vpop.f32.mrf.mxu0  ;;  %2211 = vst [vmem:[%s4567_s15 + $0xd0] sm:$0xff] %v2179_v62  ;;  %v2148_v43 = vmul.f32 %v2704_v12, %v4561_v14 }
 0x53a   : > { %v2706_v47 = vpop.f32.mrf.mxu0  ;;  %v2180_v49 = vadd.f32 %v3185_v17, %v2148_v43 }
 0x53b   : > { %v2707_v15 = vadd.f32 %v2706_v47, %v2705_v7 }
 0x53c   : > { %v2708_v13 = vpop.f32.mrf.mxu0  ;;  %2212 = vst [vmem:[%s4567_s15 + $0xd8] sm:$0xff] %v2180_v49 }
 0x53d   : > { %v2149_v54 = vmul.f32 %v2707_v15, %v4561_v14 }
 0x53e   : > { %v2709_v22 = vpop.f32.mrf.mxu0 }
 0x53f   : > { %v2181_v6 = vadd.f32 %v3186_v33, %v2149_v54  ;;  %v2710_v5 = vadd.f32 %v2709_v22, %v2708_v13 }
 0x540   : > { %v2711_v19 = vpop.f32.mrf.mxu0 }
 0x541   : > { %2213 = vst [vmem:[%s4567_s15 + $0xe0] sm:$0xff] %v2181_v6  ;;  %v2150_v41 = vmul.f32 %v2710_v5, %v4561_v14 }
 0x542   : > { %v2712_v31 = vpop.f32.mrf.mxu0 }
 0x543   : > { %v2182_v56 = vadd.f32 %v3187_v44, %v2150_v41  ;;  %v2713_v40 = vadd.f32 %v2712_v31, %v2711_v19 }
 0x544   : > { %v2714_v24 = vpop.f32.mrf.mxu0 }
 0x545   : > { %2214 = vst [vmem:[%s4567_s15 + $0xe8] sm:$0xff] %v2182_v56  ;;  %v2151_v36 = vmul.f32 %v2713_v40, %v4561_v14 }
 0x546   : > { %v2715_v25 = vpop.f32.mrf.mxu0 }
 0x547   : > { %v2183_v21 = vadd.f32 %v3188_v53, %v2151_v36  ;;  %v2716_v38 = vadd.f32 %v2715_v25, %v2714_v24 }
 0x549   : > { %2215 = vst [vmem:[%s4567_s15 + $0xf0] sm:$0xff] %v2183_v21  ;;  %v2152_v59 = vmul.f32 %v2716_v38, %v4561_v14 }
 0x54b   : > { %v2184_v10 = vadd.f32 %v3189_v57, %v2152_v59 }
 0x54d   : > { %2216 = vst [vmem:[%s4567_s15 + $0xf8] sm:$0xff] %v2184_v10 }
 0x54e   : > { %3257 = shalt.err (!%p3254_p0)
}
 0x54f   : > { %s3258_s28 = scalar_lea.hbm %s4698_s26, 4096  ;;  %s3262_s29 = scalar_lea.hbm %s4753_s8, 8192 }
 0x550   : > { %p3259_p2 = scmp.ne.s32.totalorder %s4698_s26, %s3258_s28  ;;  %p3263_p3 = scmp.lt.s32.totalorder %s4698_s26, %s4753_s8 }
 0x551   : > { %p3264_p6 = scmp.lt.s32.totalorder %s3262_s29, %s3258_s28 }
 0x552   : > { %p3260_p9 = pnand %p3259_p2, %p4909_p12 }
 0x553   : > { %p3265_p11 = por %p3264_p6, %p3263_p3 }
 0x554   : > { %p3261_p1 = pneg %p3260_p9 }
 0x556   : > { %p3266_p13 = pnand %p3265_p11, %p3261_p1 }
 0x558   : > { %3269 = shalt.err (!%p3266_p13)
}
 0x559   : > { %s3321_s10 = smov 128   ;;  %s3322_s30 = smov 8  }
 0x55a   : > { %2887 = dma.vmem_to_hbm [thread:$0]  (%p4909_p12), %s4700_s21, 4096, %s4698_s26, %s2282_s24, %s3321_s10, %s3321_s10, %s3322_s30  }
 0x55b PF: > { %s2331_s7 = sand.u32 1, %s3300_s11   ;;  %p4911_p4 = scmp.ne.s32.totalorder %s4806_s23, 0 }
 0x55c   : > { %p4912_p5 = scmp.ge.s32.totalorder %s3312_s14, 2  ;;  %s2332_s27 = scalar_lea.sflag [#allocation5], %s2331_s7 }
 0x55e   : > { %p2896_p7 = pnand %p4912_p5, %p4911_p4 }
 0x560   : > { %p2897_p8 = pneg %p2896_p7 }
 0x562   : > { %3291 = dma.done.wait (%p2897_p8), %s2332_s27, 4096  }
 0x563   : > { %3293 = vsyncadd (%p2897_p8), %s2332_s27, 4294963200  ;;  %s2341_s18 = scalar_lea.sflag [#allocation8], %s2331_s7 }
 0x564   : > { %3295 = dma.done.wait (%p2897_p8), %s2341_s18, 8192  }
 0x565   : > { %3297 = vsyncadd (%p2897_p8), %s2341_s18, 4294959104  ;;  %s4913_s22 = sld [smem:[#allocation12_spill]]  ;;  %p27_p12 = scmp.ge.s32.totalorder %s3401_s16, 4  }
 0x566   : > { %s4914_s11 = smov %s3304_s12  ;;  %s4915_s12 = smov %s3308_s13 }
 0x567   : > { %s4917_s14 = smov %s3401_s16  ;;  %29 = sbr.rel (!%p27_p12) target bundleno = 9 (0x9), region = 114 }
 0x56b   : > { %s4916_s13 = smov %s4913_s22 }
 0x56c   :  { %2346 = vsyncpa [#allocation4], 1 }
 0x56d   :  { %2348 = vsyncpa [#allocation4 + $0x1], 1 }
 0x56e   :  { %2349 = vsyncpa [#allocation5], 1 }
 0x56f   :  { %2351 = vsyncpa [#allocation5 + $0x1], 1 }
 0x570   :  { %2352 = vsyncpa [#allocation8], 1 }
 0x571   :  { %2354 = vsyncpa [#allocation8 + $0x1], 1 }

</bundles_post_ra>
